<compile_context>
chip_gen: v7x
topology: tpu7x:2x2x1
jax: 0.10.0
libtpu: 0.0.40
codegen_flags: <defaults>
</compile_context>

<pallas_src>
import jax
import jax.numpy as jnp
from jax.experimental import pallas as pl
from jax.experimental.pallas import tpu as pltpu


def _round_up(n, m):
    return ((n + m - 1) // m) * m


def _choose_batch_tile(B):
    """Pick (padded batch, batch tile). Bt is a multiple of 8; 128 rows per
    tile at large batches (matches MXU pass width, bounds per-step VMEM and
    gives grid >= 2 so ("parallel",) can shard across v7x's two TCs)."""
    Bp = _round_up(B, 8)
    if Bp <= 128:
        return Bp, Bp
    Bp = _round_up(B, 128)
    return Bp, 128


# ----------------------------------------------------------------------------
# Fused kernel: BiLSTM recurrence + masked soft-attention pooling + classifier
# ----------------------------------------------------------------------------
def fused_bilstm_attn_cls_kernel(
        x_ref, len_col_ref, len_row_ref, wih_ref, whh_f_ref, whh_b_ref,
        b_ref, wa_ref, wc_ref, bc_ref, logits_ref,
        gxf_scr, gxb_scr, hf_scr, hb_scr):
    """One batch tile.

    x_ref:       (S, Bt, E)   bf16 time-major inputs ("BERT" features)
    len_col_ref: (Bt, 1)      int32 sequence lengths (column layout)
    len_row_ref: (1, Bt)      int32 sequence lengths (row layout)
    wih_ref:     (E, 8Hp)     bf16 [fwd i,f,g,o | bwd i,f,g,o] input->gate
    whh_f/b_ref: (Hp, 4Hp)    bf16 recurrent weights per direction
    b_ref:       (1, 8Hp)     f32 fused gate bias (b_ih + b_hh), both dirs
    wa_ref:      (2, Hp)      f32 attention vector rows = [fwd half, bwd half]
    wc_ref:      (2Hp, Cp)    bf16 classifier weight (lane-padded classes)
    bc_ref:      (1, Cp)      f32 classifier bias
    logits_ref:  (Bt, Cp)     f32 output logits
    gxf/gxb_scr: (S, Bt, 4Hp) bf16 hoisted input projection, per direction
    hf/hb_scr:   (S, Bt, Hp)  bf16 per-timestep hidden states (VMEM only)
    """
    S, Bt, E = x_ref.shape
    Hp = whh_f_ref.shape[0]
    G = 4 * Hp

    # --- input projection hoisted out of the recurrence: one big MXU matmul -
    x_all = x_ref[...].reshape(S * Bt, E)        # Bt % 8 == 0 -> no relayout
    gx = jnp.dot(x_all, wih_ref[...], preferred_element_type=jnp.float32)
    gx = gx + b_ref[...]                         # bias added once, outside loop
    gxf_scr[...] = gx[:, :G].reshape(S, Bt, G).astype(jnp.bfloat16)
    gxb_scr[...] = gx[:, G:].reshape(S, Bt, G).astype(jnp.bfloat16)

    # --- recurrent weights / lengths read once (hoisted out of the loop) ----
    whh_f = whh_f_ref[...]
    whh_b = whh_b_ref[...]
    lens_col = len_col_ref[...]                  # (Bt, 1) int32

    def apply_gates(gates, c_prev):
        i_g = jax.nn.sigmoid(gates[:, 0 * Hp:1 * Hp])
        f_g = jax.nn.sigmoid(gates[:, 1 * Hp:2 * Hp])
        g_g = jnp.tanh(gates[:, 2 * Hp:3 * Hp])
        o_g = jax.nn.sigmoid(gates[:, 3 * Hp:4 * Hp])
        c_new = f_g * c_prev + i_g * g_g
        h_new = o_g * jnp.tanh(c_new)
        return h_new, c_new

    def step(t, carry):
        hf, cf, hb, cb = carry                   # f32 carries
        tb = S - 1 - t                           # backward direction time index

        # only the 4Hp gate row for each direction is loaded per step
        gates_f = gxf_scr[t].astype(jnp.float32) + jnp.dot(
            hf.astype(jnp.bfloat16), whh_f, preferred_element_type=jnp.float32)
        gates_b = gxb_scr[tb].astype(jnp.float32) + jnp.dot(
            hb.astype(jnp.bfloat16), whh_b, preferred_element_type=jnp.float32)

        hf_new, cf_new = apply_gates(gates_f, cf)
        hb_new, cb_new = apply_gates(gates_b, cb)

        # pack_padded_sequence emulation for the backward direction: hold the
        # state at 0 until the first valid token (tb == length-1) and keep it
        # zero at padded positions.  The forward output is NOT masked here:
        # the masked softmax gives exactly-zero weight to padded positions.
        valid_b = tb < lens_col                  # (Bt, 1)
        hb_new = jnp.where(valid_b, hb_new, 0.0)
        cb_new = jnp.where(valid_b, cb_new, 0.0)

        hf_scr[t] = hf_new.astype(jnp.bfloat16)
        hb_scr[tb] = hb_new.astype(jnp.bfloat16)
        return hf_new, cf_new, hb_new, cb_new

    zeros = jnp.zeros((Bt, Hp), jnp.float32)
    jax.lax.fori_loop(0, S, step, (zeros, zeros, zeros, zeros))

    # --- masked soft-attention pooling + classifier epilogue (all in VMEM) --
    hf = hf_scr[...]                             # (S, Bt, Hp) bf16
    hb = hb_scr[...]

    wa = wa_ref[...]
    wa_f = wa[0:1, :].reshape(1, 1, Hp)
    wa_b = wa[1:2, :].reshape(1, 1, Hp)

    # attention scores via VPU multiply + lane reduction (f32 accumulation)
    scores = (jnp.sum(hf * wa_f, axis=-1)
              + jnp.sum(hb * wa_b, axis=-1))     # (S, Bt) f32

    # mask rebuilt in-kernel from lengths (no HBM mask tensor).  All-pad rows
    # degenerate to a uniform attention; they are sliced off in the wrapper.
    pos = jax.lax.broadcasted_iota(jnp.int32, (S, Bt), 0)
    scores = jnp.where(pos < len_row_ref[...], scores, -1e9)
    scores = scores - jnp.max(scores, axis=0, keepdims=True)
    e = jnp.exp(scores)
    alpha = e / jnp.sum(e, axis=0, keepdims=True)   # exact softmax weights

    ctx_f = jnp.sum(alpha[:, :, None] * hf, axis=0)  # (Bt, Hp) f32
    ctx_b = jnp.sum(alpha[:, :, None] * hb, axis=0)

    wc = wc_ref[...]
    logits_ref[...] = (
        jnp.dot(ctx_f.astype(jnp.bfloat16), wc[:Hp, :],
                preferred_element_type=jnp.float32)
        + jnp.dot(ctx_b.astype(jnp.bfloat16), wc[Hp:, :],
                  preferred_element_type=jnp.float32)
        + bc_ref[...])


# ----------------------------------------------------------------------------
# Pallas wrapper
# ----------------------------------------------------------------------------
def bilstm_soft_pallas(x_tm, len_col, len_row, wih, whh_f, whh_b, b, wa, wc,
                       bc, Bt):
    S, Bp, E = x_tm.shape
    Hp = whh_f.shape[0]
    G8 = wih.shape[1]                            # 8 * Hp
    Cp = wc.shape[1]
    grid = (Bp // Bt,)

    cost = pl.CostEstimate(
        flops=int(2 * S * Bp * E * G8                 # input projection
                  + 4 * S * Bp * Hp * 4 * Hp          # recurrent matmuls
                  + 6 * S * Bp * Hp                   # attention score + ctx
                  + 4 * Bp * Hp * Cp),                # classifier
        transcendentals=int(10 * S * Bp * Hp + S * Bp),
        bytes_accessed=int(2 * S * Bp * E + 2 * E * G8 + 4 * Hp * 4 * Hp
                           + 4 * G8 + 8 * Hp + 4 * Hp * Cp + 4 * Cp
                           + 4 * Bp * Cp + 8 * Bp),
    )

    return pl.pallas_call(
        fused_bilstm_attn_cls_kernel,
        grid=grid,
        in_specs=[
            pl.BlockSpec((S, Bt, E), lambda i: (0, i, 0)),
            pl.BlockSpec((Bt, 1), lambda i: (i, 0)),
            pl.BlockSpec((1, Bt), lambda i: (0, i)),
            pl.BlockSpec((E, G8), lambda i: (0, 0)),
            pl.BlockSpec((Hp, 4 * Hp), lambda i: (0, 0)),
            pl.BlockSpec((Hp, 4 * Hp), lambda i: (0, 0)),
            pl.BlockSpec((1, G8), lambda i: (0, 0)),
            pl.BlockSpec((2, Hp), lambda i: (0, 0)),
            pl.BlockSpec((2 * Hp, Cp), lambda i: (0, 0)),
            pl.BlockSpec((1, Cp), lambda i: (0, 0)),
        ],
        out_specs=pl.BlockSpec((Bt, Cp), lambda i: (i, 0)),
        out_shape=jax.ShapeDtypeStruct((Bp, Cp), jnp.float32),
        scratch_shapes=[
            pltpu.VMEM((S, Bt, 4 * Hp), jnp.bfloat16),   # gx fwd
            pltpu.VMEM((S, Bt, 4 * Hp), jnp.bfloat16),   # gx bwd
            pltpu.VMEM((S, Bt, Hp), jnp.bfloat16),       # h fwd
            pltpu.VMEM((S, Bt, Hp), jnp.bfloat16),       # h bwd
        ],
        compiler_params=pltpu.CompilerParams(
            dimension_semantics=("parallel",),
            vmem_limit_bytes=64 * 1024 * 1024),
        cost_estimate=cost,
    )(x_tm, len_col, len_row, wih, whh_f, whh_b, b, wa, wc, bc)


# ----------------------------------------------------------------------------
# Parameter lane-padding / fusion / bf16 casting (one-time, in the wrapper)
# ----------------------------------------------------------------------------
def _pad_gate_cols(w, H, Hp):
    """(..., 4H) with gate order i,f,g,o -> (..., 4Hp), zero-padded per gate."""
    lead = w.shape[:-1]
    w4 = w.reshape(lead + (4, H))
    w4 = jnp.pad(w4, [(0, 0)] * len(lead) + [(0, 0), (0, Hp - H)])
    return w4.reshape(lead + (4 * Hp,))


def _pack_params(params, H, Hp, Cp):
    # NOTE: when importing a real PyTorch LSTM checkpoint, the fused bias must
    # be b_ih + b_hh per direction; init_params below already provides it.
    wih = jnp.concatenate([_pad_gate_cols(params["wih_f"], H, Hp),
                           _pad_gate_cols(params["wih_b"], H, Hp)], axis=1)
    b = jnp.concatenate([_pad_gate_cols(params["b_f"], H, Hp),
                         _pad_gate_cols(params["b_b"], H, Hp)], axis=1)

    def pad_whh(w):
        w = _pad_gate_cols(w, H, Hp)                      # (H, 4Hp)
        return jnp.pad(w, ((0, Hp - H), (0, 0)))          # (Hp, 4Hp)

    whh_f = pad_whh(params["whh_f"])
    whh_b = pad_whh(params["whh_b"])

    watt = params["w_att"][:, 0]                          # (2H,)
    wa = jnp.stack([jnp.pad(watt[:H], (0, Hp - H)),
                    jnp.pad(watt[H:], (0, Hp - H))], axis=0)   # (2, Hp)

    C = params["w_cls"].shape[1]
    wcf = jnp.pad(params["w_cls"][:H], ((0, Hp - H), (0, Cp - C)))
    wcb = jnp.pad(params["w_cls"][H:], ((0, Hp - H), (0, Cp - C)))
    wc = jnp.concatenate([wcf, wcb], axis=0)              # (2Hp, Cp)
    bc = jnp.pad(params["b_cls"], ((0, 0), (0, Cp - C)))  # (1, Cp)

    return (wih.astype(jnp.bfloat16),
            whh_f.astype(jnp.bfloat16),
            whh_b.astype(jnp.bfloat16),
            b.astype(jnp.float32),
            wa.astype(jnp.float32),
            wc.astype(jnp.bfloat16),
            bc.astype(jnp.float32))


# ----------------------------------------------------------------------------
# Full forward (glue in plain JAX)
# ----------------------------------------------------------------------------
def bert_lstm_soft_forward(params, input_ids, attention_mask, lengths):
    # attention_mask is accepted for interface parity with the PyTorch module;
    # the kernel rebuilds the (identical) mask from `lengths` internally.
    del attention_mask

    H = params["whh_f"].shape[0]
    C = params["w_cls"].shape[1]
    Hp = _round_up(H, 128)          # lane-padded hidden size (padded units stay 0)
    Cp = _round_up(C, 128)          # lane-padded classifier output

    wih, whh_f, whh_b, b, wa, wc, bc = _pack_params(params, H, Hp, Cp)

    # "BERT" stand-in: embedding lookup, gathered directly time-major (S,B,E).
    # TODO(synk): the real module runs a full pretrained BERT encoder here.
    x_tm = jnp.take(params["emb"], input_ids.T, axis=0).astype(jnp.bfloat16)

    S, B, _ = x_tm.shape
    Bp, Bt = _choose_batch_tile(B)
    lens = lengths.astype(jnp.int32)
    if Bp != B:
        x_tm = jnp.pad(x_tm, ((0, 0), (0, Bp - B), (0, 0)))
        lens = jnp.pad(lens, (0, Bp - B))
    len_col = lens.reshape(Bp, 1)
    len_row = lens.reshape(1, Bp)

    logits_p = bilstm_soft_pallas(x_tm, len_col, len_row, wih, whh_f, whh_b,
                                  b, wa, wc, bc, Bt)
    # Dropout is identity in eval mode.
    return logits_p[:B, :C]


def init_params(key, vocab, embed, hidden, num_classes):
    ks = jax.random.split(key, 9)
    s = 0.1
    return {
        "emb":   jax.random.normal(ks[0], (vocab, embed), jnp.float32) * s,
        "wih_f": jax.random.normal(ks[1], (embed, 4 * hidden), jnp.float32) * s,
        "whh_f": jax.random.normal(ks[2], (hidden, 4 * hidden), jnp.float32) * s,
        "b_f":   jnp.zeros((1, 4 * hidden), jnp.float32),
        "wih_b": jax.random.normal(ks[3], (embed, 4 * hidden), jnp.float32) * s,
        "whh_b": jax.random.normal(ks[4], (hidden, 4 * hidden), jnp.float32) * s,
        "b_b":   jnp.zeros((1, 4 * hidden), jnp.float32),
        "w_att": jax.random.normal(ks[5], (2 * hidden, 1), jnp.float32) * s,
        "w_cls": jax.random.normal(ks[6], (2 * hidden, num_classes), jnp.float32) * s,
        "b_cls": jnp.zeros((1, num_classes), jnp.float32),
    }


if __name__ == "__main__":
    B, S = 2, 8
    VOCAB, EMBED, HIDDEN, NUM_CLASSES = 100, 32, 32, 2

    key = jax.random.PRNGKey(0)
    k_ids, k_params = jax.random.split(key)

    input_ids = jax.random.randint(k_ids, (B, S), 0, VOCAB, dtype=jnp.int32)
    lengths = jnp.array([8, 5], dtype=jnp.int32)
    attention_mask = (jnp.arange(S)[None, :] < lengths[:, None]).astype(jnp.int32)

    params = init_params(k_params, VOCAB, EMBED, HIDDEN, NUM_CLASSES)

    fwd = jax.jit(bert_lstm_soft_forward)
    logits = fwd(params, input_ids, attention_mask, lengths)
    jax.block_until_ready(logits)

    assert logits.shape == (B, NUM_CLASSES)
    assert jnp.all(jnp.isfinite(logits))
    print("KERNEL_OK")
</pallas_src>

<mosaic_0001>
module attributes {stable_mosaic.version = 11 : i64} {
  func.func @fused_bilstm_attn_cls_kernel(%arg0: i32, %arg1: memref<8x8x32xbf16, #tpu.memory_space<vmem>>, %arg2: memref<8x1xi32, #tpu.memory_space<vmem>>, %arg3: memref<1x8xi32, #tpu.memory_space<vmem>>, %arg4: memref<32x1024xbf16, #tpu.memory_space<vmem>>, %arg5: memref<128x512xbf16, #tpu.memory_space<vmem>>, %arg6: memref<128x512xbf16, #tpu.memory_space<vmem>>, %arg7: memref<1x1024xf32, #tpu.memory_space<vmem>>, %arg8: memref<2x128xf32, #tpu.memory_space<vmem>>, %arg9: memref<256x128xbf16, #tpu.memory_space<vmem>>, %arg10: memref<1x128xf32, #tpu.memory_space<vmem>>, %arg11: memref<8x128xf32, #tpu.memory_space<vmem>>, %arg12: memref<8x8x512xbf16, #tpu.memory_space<vmem>>, %arg13: memref<8x8x512xbf16, #tpu.memory_space<vmem>>, %arg14: memref<8x8x128xbf16, #tpu.memory_space<vmem>>, %arg15: memref<8x8x128xbf16, #tpu.memory_space<vmem>>) attributes {dimension_semantics = [#tpu.dimension_semantics<parallel>], iteration_bounds = array<i64: 1>, scalar_prefetch = 0 : i64, scratch_operands = 4 : i64, tpu.core_type = #tpu.core_type<tc>, window_params = [{transform_indices = @transform_0, window_bounds = array<i64: 8, 8, 32>}, {transform_indices = @transform_1, window_bounds = array<i64: 8, 1>}, {transform_indices = @transform_2, window_bounds = array<i64: 1, 8>}, {pipeline_mode = #tpu.pipeline_mode<synchronous>, transform_indices = @transform_3, window_bounds = array<i64: 32, 1024>}, {pipeline_mode = #tpu.pipeline_mode<synchronous>, transform_indices = @transform_4, window_bounds = array<i64: 128, 512>}, {pipeline_mode = #tpu.pipeline_mode<synchronous>, transform_indices = @transform_5, window_bounds = array<i64: 128, 512>}, {pipeline_mode = #tpu.pipeline_mode<synchronous>, transform_indices = @transform_6, window_bounds = array<i64: 1, 1024>}, {pipeline_mode = #tpu.pipeline_mode<synchronous>, transform_indices = @transform_7, window_bounds = array<i64: 2, 128>}, {pipeline_mode = #tpu.pipeline_mode<synchronous>, transform_indices = @transform_8, window_bounds = array<i64: 256, 128>}, {pipeline_mode = #tpu.pipeline_mode<synchronous>, transform_indices = @transform_9, window_bounds = array<i64: 1, 128>}, {transform_indices = @transform_10, window_bounds = array<i64: 8, 128>}]} {
    %c0 = arith.constant 0 : index
    %c0_0 = arith.constant 0 : index
    %c0_1 = arith.constant 0 : index
    %0 = vector.load %arg1[%c0, %c0_0, %c0_1] : memref<8x8x32xbf16, #tpu.memory_space<vmem>>, vector<8x8x32xbf16>
    %1 = vector.shape_cast %0 : vector<8x8x32xbf16> to vector<64x32xbf16>
    %c0_2 = arith.constant 0 : index
    %c0_3 = arith.constant 0 : index
    %2 = vector.load %arg4[%c0_2, %c0_3] : memref<32x1024xbf16, #tpu.memory_space<vmem>>, vector<32x1024xbf16>
    %cst = arith.constant dense<0.000000e+00> : vector<64x1024xf32>
    %3 = tpu.matmul %1, %2, %cst {dimension_numbers = #tpu.dot_dimension_numbers<[1], [0], [0], [1], [0, 0, 1, 1], [], []>} : vector<64x32xbf16>, vector<32x1024xbf16>, vector<64x1024xf32> -> vector<64x1024xf32>
    %c0_4 = arith.constant 0 : index
    %c0_5 = arith.constant 0 : index
    %4 = vector.load %arg7[%c0_4, %c0_5] : memref<1x1024xf32, #tpu.memory_space<vmem>>, vector<1x1024xf32>
    %5 = vector.broadcast %4 : vector<1x1024xf32> to vector<64x1024xf32>
    %6 = arith.addf %3, %5 : vector<64x1024xf32>
    %7 = vector.extract_strided_slice %6 {offsets = [0, 0], sizes = [64, 512], strides = [1, 1]} : vector<64x1024xf32> to vector<64x512xf32>
    %8 = vector.shape_cast %7 : vector<64x512xf32> to vector<8x8x512xf32>
    %9 = arith.truncf %8 : vector<8x8x512xf32> to vector<8x8x512xbf16>
    %c0_6 = arith.constant 0 : index
    %c0_7 = arith.constant 0 : index
    %c0_8 = arith.constant 0 : index
    %10 = vector.load %arg12[%c0_6, %c0_7, %c0_8] : memref<8x8x512xbf16, #tpu.memory_space<vmem>>, vector<8x8x512xbf16>
    tpu.vector_store %arg12[%c0_6, %c0_7, %c0_8], %9 {strides = array<i32>} : memref<8x8x512xbf16, #tpu.memory_space<vmem>>, vector<8x8x512xbf16>,
    %11 = vector.extract_strided_slice %6 {offsets = [0, 512], sizes = [64, 512], strides = [1, 1]} : vector<64x1024xf32> to vector<64x512xf32>
    %12 = vector.shape_cast %11 : vector<64x512xf32> to vector<8x8x512xf32>
    %13 = arith.truncf %12 : vector<8x8x512xf32> to vector<8x8x512xbf16>
    %c0_9 = arith.constant 0 : index
    %c0_10 = arith.constant 0 : index
    %c0_11 = arith.constant 0 : index
    %14 = vector.load %arg13[%c0_9, %c0_10, %c0_11] : memref<8x8x512xbf16, #tpu.memory_space<vmem>>, vector<8x8x512xbf16>
    tpu.vector_store %arg13[%c0_9, %c0_10, %c0_11], %13 {strides = array<i32>} : memref<8x8x512xbf16, #tpu.memory_space<vmem>>, vector<8x8x512xbf16>,
    %c0_12 = arith.constant 0 : index
    %c0_13 = arith.constant 0 : index
    %15 = vector.load %arg5[%c0_12, %c0_13] : memref<128x512xbf16, #tpu.memory_space<vmem>>, vector<128x512xbf16>
    %c0_14 = arith.constant 0 : index
    %c0_15 = arith.constant 0 : index
    %16 = vector.load %arg6[%c0_14, %c0_15] : memref<128x512xbf16, #tpu.memory_space<vmem>>, vector<128x512xbf16>
    %c0_16 = arith.constant 0 : index
    %c0_17 = arith.constant 0 : index
    %17 = vector.load %arg2[%c0_16, %c0_17] : memref<8x1xi32, #tpu.memory_space<vmem>>, vector<8x1xi32>
    %cst_18 = arith.constant 0.000000e+00 : f32
    %18 = vector.broadcast %cst_18 : f32 to vector<8x128xf32>
    %c0_i32 = arith.constant 0 : i32
    %c8_i32 = arith.constant 8 : i32
    %19 = arith.addi %c0_i32, %c8_i32 : i32
    %c1_i32 = arith.constant 1 : i32
    %20:4 = scf.for %arg16 = %c0_i32 to %19 step %c1_i32 iter_args(%arg17 = %18, %arg18 = %18, %arg19 = %18, %arg20 = %18) -> (vector<8x128xf32>, vector<8x128xf32>, vector<8x128xf32>, vector<8x128xf32>)  : i32 {
      %c7_i32 = arith.constant 7 : i32
      %74 = arith.subi %c7_i32, %arg16 : i32
      %75 = arith.index_cast %arg16 : i32 to index
      %c0_45 = arith.constant 0 : index
      %c0_46 = arith.constant 0 : index
      %76 = vector.load %arg12[%75, %c0_45, %c0_46] : memref<8x8x512xbf16, #tpu.memory_space<vmem>>, vector<1x8x512xbf16>
      %77 = vector.shape_cast %76 : vector<1x8x512xbf16> to vector<8x512xbf16>
      %78 = arith.extf %77 : vector<8x512xbf16> to vector<8x512xf32>
      %79 = arith.truncf %arg17 : vector<8x128xf32> to vector<8x128xbf16>
      %cst_47 = arith.constant dense<0.000000e+00> : vector<8x512xf32>
      %80 = tpu.matmul %79, %15, %cst_47 {dimension_numbers = #tpu.dot_dimension_numbers<[1], [0], [0], [1], [0, 0, 1, 1], [], []>} : vector<8x128xbf16>, vector<128x512xbf16>, vector<8x512xf32> -> vector<8x512xf32>
      %81 = arith.addf %78, %80 : vector<8x512xf32>
      %82 = arith.index_cast %74 : i32 to index
      %c0_48 = arith.constant 0 : index
      %c0_49 = arith.constant 0 : index
      %83 = vector.load %arg13[%82, %c0_48, %c0_49] : memref<8x8x512xbf16, #tpu.memory_space<vmem>>, vector<1x8x512xbf16>
      %84 = vector.shape_cast %83 : vector<1x8x512xbf16> to vector<8x512xbf16>
      %85 = arith.extf %84 : vector<8x512xbf16> to vector<8x512xf32>
      %86 = arith.truncf %arg19 : vector<8x128xf32> to vector<8x128xbf16>
      %cst_50 = arith.constant dense<0.000000e+00> : vector<8x512xf32>
      %87 = tpu.matmul %86, %16, %cst_50 {dimension_numbers = #tpu.dot_dimension_numbers<[1], [0], [0], [1], [0, 0, 1, 1], [], []>} : vector<8x128xbf16>, vector<128x512xbf16>, vector<8x512xf32> -> vector<8x512xf32>
      %88 = arith.addf %85, %87 : vector<8x512xf32>
      %89 = vector.extract_strided_slice %81 {offsets = [0, 0], sizes = [8, 128], strides = [1, 1]} : vector<8x512xf32> to vector<8x128xf32>
      %90 = arith.negf %89 : vector<8x128xf32>
      %91 = math.exp %90 : vector<8x128xf32>
      %cst_51 = arith.constant 1.000000e+00 : f32
      %92 = vector.broadcast %cst_51 : f32 to vector<8x128xf32>
      %93 = arith.addf %92, %91 : vector<8x128xf32>
      %94 = arith.divf %92, %93 : vector<8x128xf32>
      %95 = vector.extract_strided_slice %81 {offsets = [0, 128], sizes = [8, 128], strides = [1, 1]} : vector<8x512xf32> to vector<8x128xf32>
      %96 = arith.negf %95 : vector<8x128xf32>
      %97 = math.exp %96 : vector<8x128xf32>
      %cst_52 = arith.constant 1.000000e+00 : f32
      %98 = vector.broadcast %cst_52 : f32 to vector<8x128xf32>
      %99 = arith.addf %98, %97 : vector<8x128xf32>
      %100 = arith.divf %98, %99 : vector<8x128xf32>
      %101 = vector.extract_strided_slice %81 {offsets = [0, 256], sizes = [8, 128], strides = [1, 1]} : vector<8x512xf32> to vector<8x128xf32>
      %102 = math.tanh %101 : vector<8x128xf32>
      %103 = vector.extract_strided_slice %81 {offsets = [0, 384], sizes = [8, 128], strides = [1, 1]} : vector<8x512xf32> to vector<8x128xf32>
      %104 = arith.negf %103 : vector<8x128xf32>
      %105 = math.exp %104 : vector<8x128xf32>
      %cst_53 = arith.constant 1.000000e+00 : f32
      %106 = vector.broadcast %cst_53 : f32 to vector<8x128xf32>
      %107 = arith.addf %106, %105 : vector<8x128xf32>
      %108 = arith.divf %106, %107 : vector<8x128xf32>
      %109 = arith.mulf %100, %arg18 : vector<8x128xf32>
      %110 = arith.mulf %94, %102 : vector<8x128xf32>
      %111 = arith.addf %109, %110 : vector<8x128xf32>
      %112 = math.tanh %111 : vector<8x128xf32>
      %113 = arith.mulf %108, %112 : vector<8x128xf32>
      %114 = vector.extract_strided_slice %88 {offsets = [0, 0], sizes = [8, 128], strides = [1, 1]} : vector<8x512xf32> to vector<8x128xf32>
      %115 = arith.negf %114 : vector<8x128xf32>
      %116 = math.exp %115 : vector<8x128xf32>
      %cst_54 = arith.constant 1.000000e+00 : f32
      %117 = vector.broadcast %cst_54 : f32 to vector<8x128xf32>
      %118 = arith.addf %117, %116 : vector<8x128xf32>
      %119 = arith.divf %117, %118 : vector<8x128xf32>
      %120 = vector.extract_strided_slice %88 {offsets = [0, 128], sizes = [8, 128], strides = [1, 1]} : vector<8x512xf32> to vector<8x128xf32>
      %121 = arith.negf %120 : vector<8x128xf32>
      %122 = math.exp %121 : vector<8x128xf32>
      %cst_55 = arith.constant 1.000000e+00 : f32
      %123 = vector.broadcast %cst_55 : f32 to vector<8x128xf32>
      %124 = arith.addf %123, %122 : vector<8x128xf32>
      %125 = arith.divf %123, %124 : vector<8x128xf32>
      %126 = vector.extract_strided_slice %88 {offsets = [0, 256], sizes = [8, 128], strides = [1, 1]} : vector<8x512xf32> to vector<8x128xf32>
      %127 = math.tanh %126 : vector<8x128xf32>
      %128 = vector.extract_strided_slice %88 {offsets = [0, 384], sizes = [8, 128], strides = [1, 1]} : vector<8x512xf32> to vector<8x128xf32>
      %129 = arith.negf %128 : vector<8x128xf32>
      %130 = math.exp %129 : vector<8x128xf32>
      %cst_56 = arith.constant 1.000000e+00 : f32
      %131 = vector.broadcast %cst_56 : f32 to vector<8x128xf32>
      %132 = arith.addf %131, %130 : vector<8x128xf32>
      %133 = arith.divf %131, %132 : vector<8x128xf32>
      %134 = arith.mulf %125, %arg20 : vector<8x128xf32>
      %135 = arith.mulf %119, %127 : vector<8x128xf32>
      %136 = arith.addf %134, %135 : vector<8x128xf32>
      %137 = math.tanh %136 : vector<8x128xf32>
      %138 = arith.mulf %133, %137 : vector<8x128xf32>
      %139 = vector.broadcast %74 : i32 to vector<8x1xi32>
      %140 = arith.cmpi slt, %139, %17 : vector<8x1xi32>
      %cst_57 = arith.constant 0.000000e+00 : f32
      %141 = vector.shape_cast %140 : vector<8x1xi1> to vector<8x1xi1>
      %142 = vector.broadcast %141 : vector<8x1xi1> to vector<8x128xi1>
      %143 = vector.broadcast %cst_57 : f32 to vector<8x128xf32>
      %144 = arith.select %142, %138, %143 : vector<8x128xi1>, vector<8x128xf32>
      %cst_58 = arith.constant 0.000000e+00 : f32
      %145 = vector.shape_cast %140 : vector<8x1xi1> to vector<8x1xi1>
      %146 = vector.broadcast %145 : vector<8x1xi1> to vector<8x128xi1>
      %147 = vector.broadcast %cst_58 : f32 to vector<8x128xf32>
      %148 = arith.select %146, %136, %147 : vector<8x128xi1>, vector<8x128xf32>
      %149 = arith.truncf %113 : vector<8x128xf32> to vector<8x128xbf16>
      %150 = arith.index_cast %arg16 : i32 to index
      %c0_59 = arith.constant 0 : index
      %c0_60 = arith.constant 0 : index
      %151 = vector.load %arg14[%150, %c0_59, %c0_60] : memref<8x8x128xbf16, #tpu.memory_space<vmem>>, vector<1x8x128xbf16>
      %152 = vector.shape_cast %151 : vector<1x8x128xbf16> to vector<8x128xbf16>
      %153 = vector.shape_cast %149 : vector<8x128xbf16> to vector<1x8x128xbf16>
      tpu.vector_store %arg14[%150, %c0_59, %c0_60], %153 {strides = array<i32>} : memref<8x8x128xbf16, #tpu.memory_space<vmem>>, vector<1x8x128xbf16>,
      %154 = arith.truncf %144 : vector<8x128xf32> to vector<8x128xbf16>
      %155 = arith.index_cast %74 : i32 to index
      %c0_61 = arith.constant 0 : index
      %c0_62 = arith.constant 0 : index
      %156 = vector.load %arg15[%155, %c0_61, %c0_62] : memref<8x8x128xbf16, #tpu.memory_space<vmem>>, vector<1x8x128xbf16>
      %157 = vector.shape_cast %156 : vector<1x8x128xbf16> to vector<8x128xbf16>
      %158 = vector.shape_cast %154 : vector<8x128xbf16> to vector<1x8x128xbf16>
      tpu.vector_store %arg15[%155, %c0_61, %c0_62], %158 {strides = array<i32>} : memref<8x8x128xbf16, #tpu.memory_space<vmem>>, vector<1x8x128xbf16>,
      scf.yield %113, %111, %144, %148 : vector<8x128xf32>, vector<8x128xf32>, vector<8x128xf32>, vector<8x128xf32>
    }
    %c8_i32_19 = arith.constant 8 : i32
    %c0_20 = arith.constant 0 : index
    %c0_21 = arith.constant 0 : index
    %c0_22 = arith.constant 0 : index
    %21 = vector.load %arg14[%c0_20, %c0_21, %c0_22] : memref<8x8x128xbf16, #tpu.memory_space<vmem>>, vector<8x8x128xbf16>
    %c0_23 = arith.constant 0 : index
    %c0_24 = arith.constant 0 : index
    %c0_25 = arith.constant 0 : index
    %22 = vector.load %arg15[%c0_23, %c0_24, %c0_25] : memref<8x8x128xbf16, #tpu.memory_space<vmem>>, vector<8x8x128xbf16>
    %c0_26 = arith.constant 0 : index
    %c0_27 = arith.constant 0 : index
    %23 = vector.load %arg8[%c0_26, %c0_27] : memref<2x128xf32, #tpu.memory_space<vmem>>, vector<2x128xf32>
    %24 = vector.extract_strided_slice %23 {offsets = [0, 0], sizes = [1, 128], strides = [1, 1]} : vector<2x128xf32> to vector<1x128xf32>
    %25 = vector.shape_cast %24 : vector<1x128xf32> to vector<1x1x128xf32>
    %26 = vector.extract_strided_slice %23 {offsets = [1, 0], sizes = [1, 128], strides = [1, 1]} : vector<2x128xf32> to vector<1x128xf32>
    %27 = vector.shape_cast %26 : vector<1x128xf32> to vector<1x1x128xf32>
    %28 = arith.extf %21 : vector<8x8x128xbf16> to vector<8x8x128xf32>
    %29 = vector.broadcast %25 : vector<1x1x128xf32> to vector<8x8x128xf32>
    %30 = arith.mulf %28, %29 : vector<8x8x128xf32>
    %cst_28 = arith.constant dense<0.000000e+00> : vector<8x8xf32>
    %31 = vector.multi_reduction <add>, %30, %cst_28 [2] : vector<8x8x128xf32> to vector<8x8xf32>
    %32 = arith.extf %22 : vector<8x8x128xbf16> to vector<8x8x128xf32>
    %33 = vector.broadcast %27 : vector<1x1x128xf32> to vector<8x8x128xf32>
    %34 = arith.mulf %32, %33 : vector<8x8x128xf32>
    %cst_29 = arith.constant dense<0.000000e+00> : vector<8x8xf32>
    %35 = vector.multi_reduction <add>, %34, %cst_29 [2] : vector<8x8x128xf32> to vector<8x8xf32>
    %36 = arith.addf %31, %35 : vector<8x8xf32>
    %37 = tpu.iota {dimensions = array<i32: 0>} : vector<8x8xi32>
    %c0_30 = arith.constant 0 : index
    %c0_31 = arith.constant 0 : index
    %38 = vector.load %arg3[%c0_30, %c0_31] : memref<1x8xi32, #tpu.memory_space<vmem>>, vector<1x8xi32>
    %39 = vector.broadcast %38 : vector<1x8xi32> to vector<8x8xi32>
    %40 = arith.cmpi slt, %37, %39 : vector<8x8xi32>
    %cst_32 = arith.constant -1.000000e+09 : f32
    %41 = vector.broadcast %cst_32 : f32 to vector<8x8xf32>
    %42 = arith.select %40, %36, %41 : vector<8x8xi1>, vector<8x8xf32>
    %cst_33 = arith.constant dense<0xFF800000> : vector<8xf32>
    %43 = vector.multi_reduction <maximumf>, %42, %cst_33 [0] : vector<8x8xf32> to vector<8xf32>
    %44 = vector.shape_cast %43 : vector<8xf32> to vector<1x8xf32>
    %45 = vector.broadcast %44 : vector<1x8xf32> to vector<8x8xf32>
    %46 = arith.subf %42, %45 : vector<8x8xf32>
    %47 = math.exp %46 : vector<8x8xf32>
    %cst_34 = arith.constant dense<0.000000e+00> : vector<8xf32>
    %48 = vector.multi_reduction <add>, %47, %cst_34 [0] : vector<8x8xf32> to vector<8xf32>
    %49 = vector.shape_cast %48 : vector<8xf32> to vector<1x8xf32>
    %50 = vector.broadcast %49 : vector<1x8xf32> to vector<8x8xf32>
    %51 = arith.divf %47, %50 : vector<8x8xf32>
    %52 = vector.shape_cast %51 : vector<8x8xf32> to vector<8x8x1xf32>
    %53 = arith.extf %21 : vector<8x8x128xbf16> to vector<8x8x128xf32>
    %54 = vector.broadcast %52 : vector<8x8x1xf32> to vector<8x8x128xf32>
    %55 = arith.mulf %54, %53 : vector<8x8x128xf32>
    %cst_35 = arith.constant dense<0.000000e+00> : vector<8x128xf32>
    %56 = vector.multi_reduction <add>, %55, %cst_35 [0] : vector<8x8x128xf32> to vector<8x128xf32>
    %57 = vector.shape_cast %51 : vector<8x8xf32> to vector<8x8x1xf32>
    %58 = arith.extf %22 : vector<8x8x128xbf16> to vector<8x8x128xf32>
    %59 = vector.broadcast %57 : vector<8x8x1xf32> to vector<8x8x128xf32>
    %60 = arith.mulf %59, %58 : vector<8x8x128xf32>
    %cst_36 = arith.constant dense<0.000000e+00> : vector<8x128xf32>
    %61 = vector.multi_reduction <add>, %60, %cst_36 [0] : vector<8x8x128xf32> to vector<8x128xf32>
    %c0_37 = arith.constant 0 : index
    %c0_38 = arith.constant 0 : index
    %62 = vector.load %arg9[%c0_37, %c0_38] : memref<256x128xbf16, #tpu.memory_space<vmem>>, vector<256x128xbf16>
    %63 = arith.truncf %56 : vector<8x128xf32> to vector<8x128xbf16>
    %64 = vector.extract_strided_slice %62 {offsets = [0, 0], sizes = [128, 128], strides = [1, 1]} : vector<256x128xbf16> to vector<128x128xbf16>
    %cst_39 = arith.constant dense<0.000000e+00> : vector<8x128xf32>
    %65 = tpu.matmul %63, %64, %cst_39 {dimension_numbers = #tpu.dot_dimension_numbers<[1], [0], [0], [1], [0, 0, 1, 1], [], []>} : vector<8x128xbf16>, vector<128x128xbf16>, vector<8x128xf32> -> vector<8x128xf32>
    %66 = arith.truncf %61 : vector<8x128xf32> to vector<8x128xbf16>
    %67 = vector.extract_strided_slice %62 {offsets = [128, 0], sizes = [128, 128], strides = [1, 1]} : vector<256x128xbf16> to vector<128x128xbf16>
    %cst_40 = arith.constant dense<0.000000e+00> : vector<8x128xf32>
    %68 = tpu.matmul %66, %67, %cst_40 {dimension_numbers = #tpu.dot_dimension_numbers<[1], [0], [0], [1], [0, 0, 1, 1], [], []>} : vector<8x128xbf16>, vector<128x128xbf16>, vector<8x128xf32> -> vector<8x128xf32>
    %69 = arith.addf %65, %68 : vector<8x128xf32>
    %c0_41 = arith.constant 0 : index
    %c0_42 = arith.constant 0 : index
    %70 = vector.load %arg10[%c0_41, %c0_42] : memref<1x128xf32, #tpu.memory_space<vmem>>, vector<1x128xf32>
    %71 = vector.broadcast %70 : vector<1x128xf32> to vector<8x128xf32>
    %72 = arith.addf %69, %71 : vector<8x128xf32>
    %c0_43 = arith.constant 0 : index
    %c0_44 = arith.constant 0 : index
    %73 = vector.load %arg11[%c0_43, %c0_44] : memref<8x128xf32, #tpu.memory_space<vmem>>, vector<8x128xf32>
    tpu.vector_store %arg11[%c0_43, %c0_44], %72 {strides = array<i32>} : memref<8x128xf32, #tpu.memory_space<vmem>>, vector<8x128xf32>,
    return
  }
  func.func @transform_0(%arg0: i32) -> (i32, i32, i32) {
    %c0_i32 = arith.constant 0 : i32
    %c0_i32_0 = arith.constant 0 : i32
    %c0_i32_1 = arith.constant 0 : i32
    return %c0_i32, %arg0, %c0_i32_0 : i32, i32, i32
  }
  func.func @transform_1(%arg0: i32) -> (i32, i32) {
    %c0_i32 = arith.constant 0 : i32
    %c0_i32_0 = arith.constant 0 : i32
    return %arg0, %c0_i32 : i32, i32
  }
  func.func @transform_2(%arg0: i32) -> (i32, i32) {
    %c0_i32 = arith.constant 0 : i32
    %c0_i32_0 = arith.constant 0 : i32
    return %c0_i32, %arg0 : i32, i32
  }
  func.func @transform_3(%arg0: i32) -> (i32, i32) {
    %c0_i32 = arith.constant 0 : i32
    %c0_i32_0 = arith.constant 0 : i32
    %c0_i32_1 = arith.constant 0 : i32
    return %c0_i32, %c0_i32_0 : i32, i32
  }
  func.func @transform_4(%arg0: i32) -> (i32, i32) {
    %c0_i32 = arith.constant 0 : i32
    %c0_i32_0 = arith.constant 0 : i32
    %c0_i32_1 = arith.constant 0 : i32
    return %c0_i32, %c0_i32_0 : i32, i32
  }
  func.func @transform_5(%arg0: i32) -> (i32, i32) {
    %c0_i32 = arith.constant 0 : i32
    %c0_i32_0 = arith.constant 0 : i32
    %c0_i32_1 = arith.constant 0 : i32
    return %c0_i32, %c0_i32_0 : i32, i32
  }
  func.func @transform_6(%arg0: i32) -> (i32, i32) {
    %c0_i32 = arith.constant 0 : i32
    %c0_i32_0 = arith.constant 0 : i32
    %c0_i32_1 = arith.constant 0 : i32
    return %c0_i32, %c0_i32_0 : i32, i32
  }
  func.func @transform_7(%arg0: i32) -> (i32, i32) {
    %c0_i32 = arith.constant 0 : i32
    %c0_i32_0 = arith.constant 0 : i32
    %c0_i32_1 = arith.constant 0 : i32
    return %c0_i32, %c0_i32_0 : i32, i32
  }
  func.func @transform_8(%arg0: i32) -> (i32, i32) {
    %c0_i32 = arith.constant 0 : i32
    %c0_i32_0 = arith.constant 0 : i32
    %c0_i32_1 = arith.constant 0 : i32
    return %c0_i32, %c0_i32_0 : i32, i32
  }
  func.func @transform_9(%arg0: i32) -> (i32, i32) {
    %c0_i32 = arith.constant 0 : i32
    %c0_i32_0 = arith.constant 0 : i32
    %c0_i32_1 = arith.constant 0 : i32
    return %c0_i32, %c0_i32_0 : i32, i32
  }
  func.func @transform_10(%arg0: i32) -> (i32, i32) {
    %c0_i32 = arith.constant 0 : i32
    %c0_i32_0 = arith.constant 0 : i32
    return %arg0, %c0_i32 : i32, i32
  }
}

</mosaic_0001>

<bundles_post_ra>
// kernel: bert_lstm_soft_forward.1
= control target key start
LH: loop header
LB: loop body
LE: loop exit
PB: predicated region body
PF: predicated region fallthrough
CT: control target
= control target key end

     0   :  { %15 = vsyncpa [#allocation7], 0  ;;  %s3640_s0 = inlined_call_operand.hbm [shape: bf16[8,8,32], index: 0, kind: input, shape index: {}]   ;;  %s3641_s1 = inlined_call_operand.hbm [shape: s32[8,1], index: 1, kind: input, shape index: {}]   ;;  %s3642_s2 = inlined_call_operand.hbm [shape: s32[1,8], index: 2, kind: input, shape index: {}]   ;;  %s3643_s3 = inlined_call_operand.hbm [shape: bf16[32,1024], index: 3, kind: input, shape index: {}]   ;;  %s3644_s4 = inlined_call_operand.hbm [shape: bf16[128,512], index: 4, kind: input, shape index: {}]   ;;  %s3645_s5 = inlined_call_operand.hbm [shape: bf16[128,512], index: 5, kind: input, shape index: {}]   ;;  %s3646_s6 = inlined_call_operand.hbm [shape: f32[1,1024], index: 6, kind: input, shape index: {}]   ;;  %s3647_s7 = inlined_call_operand.hbm [shape: f32[2,128], index: 7, kind: input, shape index: {}]   ;;  %s3648_s8 = inlined_call_operand.hbm [shape: bf16[256,128], index: 8, kind: input, shape index: {}]   ;;  %s3649_s9 = inlined_call_operand.hbm [shape: f32[1,128], index: 9, kind: input, shape index: {}]   ;;  %s3650_s10 = inlined_call_operand.hbm [shape: f32[8,128], index: 10, kind: output, shape index: {}]  }
   0x1   :  { %16 = vsyncpa [#allocation10], 0 }
   0x2   :  { %17 = vsyncpa [#allocation13], 0 }
   0x3   :  { %18 = vsyncpa [#allocation16], 0 }
   0x4   :  { %19 = vsyncpa [#allocation19], 0 }
   0x5   :  { %20 = vsyncpa [#allocation22], 0 }
   0x6   :  { %21 = vsyncpa [#allocation8], 0  ;;  %s2814_s13 = smov [#allocation9]   ;;  %s2815_s15 = smov [#allocation12]  }
   0x7   :  { %s40_s14 = sshll.u32 %s2814_s13, 4  ;;  %s59_s16 = sshll.u32 %s2815_s15, 4  ;;  %s41_s14 = int_to_ptr.vmem [resolvable:$true] %s40_s14  ;;  %s2890_s16 = int_to_ptr.vmem [resolvable:$true] %s59_s16 }
   0x8   :  { %s2518_s19 = scalar_lea.hbm %s3641_s1, 128 }
   0x9   :  { %p2519_p0 = scmp.ne.s32.totalorder %s3641_s1, %s2518_s19  ;;  %p2522_p1 = scmp.lt.u32.totalorder %s2518_s19, %s3641_s1 }
   0xb   :  { %p2524_p2 = pnand %p2522_p1, %p2519_p0 }
   0xd   :  { %2527 = shalt.err (!%p2524_p2)
}
   0xe   :  { %s2528_s24 = scalar_lea.vmem %s41_s14, 128  ;;  %p2533_p4 = scmp.lt.s32.totalorder %s41_s14, %s41_s14 }
   0xf   :  { %p2529_p3 = scmp.ne.s32.totalorder %s41_s14, %s2528_s24  ;;  %p2534_p5 = scmp.lt.s32.totalorder %s2528_s24, %s2528_s24 }
  0x11   :  { %p2535_p6 = por %p2534_p5, %p2533_p4 }
  0x13   :  { %p2536_p7 = pnand %p2535_p6, %p2529_p3 }
  0x15   :  { %2539 = shalt.err (!%p2536_p7)
}
  0x16   :  { %43 = dma.hbm_to_vmem [thread:$0]  %s3641_s1, 128, %s41_s14, [#allocation10]  }
  0x17   :  { %s2540_s29 = scalar_lea.hbm %s3643_s3, 2048 }
  0x18   :  { %p2541_p8 = scmp.ne.s32.totalorder %s3643_s3, %s2540_s29  ;;  %p2544_p9 = scmp.lt.u32.totalorder %s2540_s29, %s3643_s3 }
  0x1a   :  { %p2546_p10 = pnand %p2544_p9, %p2541_p8 }
  0x1c   :  { %2549 = shalt.err (!%p2546_p10)
}
  0x1d   :  { %s2550_s15 = scalar_lea.vmem %s2890_s16, 2048  ;;  %p2555_p12 = scmp.lt.s32.totalorder %s2890_s16, %s2890_s16 }
  0x1e   :  { %p2551_p11 = scmp.ne.s32.totalorder %s2890_s16, %s2550_s15  ;;  %p2556_p13 = scmp.lt.s32.totalorder %s2550_s15, %s2550_s15 }
  0x20   :  { %p2557_p0 = por %p2556_p13, %p2555_p12 }
  0x22   :  { %p2558_p1 = pnand %p2557_p0, %p2551_p11 }
  0x24   :  { %2561 = shalt.err (!%p2558_p1)
}
  0x25   :  { %s2816_s1 = smov 512   ;;  %s2817_s14 = smov 32  }
  0x26   :  { %65 = dma.hbm_to_vmem [thread:$0]  %s3643_s3, 2048, %s2890_s16, [#allocation13], %s2816_s1, %s2816_s1, %s2817_s14  }
  0x27   :  { %s2818_s19 = smov [#allocation15]   ;;  %s2819_s21 = smov [#allocation18]  }
  0x28   :  { %s83_s20 = sshll.u32 %s2818_s19, 4  ;;  %s106_s22 = sshll.u32 %s2819_s21, 4  ;;  %s84_s20 = int_to_ptr.vmem [resolvable:$true] %s83_s20  ;;  %s107_s22 = int_to_ptr.vmem [resolvable:$true] %s106_s22 }
  0x29   :  { %s2562_s25 = scalar_lea.hbm %s3645_s5, 4096 }
  0x2a   :  { %p2563_p2 = scmp.ne.s32.totalorder %s3645_s5, %s2562_s25  ;;  %p2566_p3 = scmp.lt.u32.totalorder %s2562_s25, %s3645_s5 }
  0x2c   :  { %p2568_p4 = pnand %p2566_p3, %p2563_p2 }
  0x2e   :  { %2571 = shalt.err (!%p2568_p4)
}
  0x2f   :  { %s2572_s3 = scalar_lea.vmem %s84_s20, 4096  ;;  %p2577_p6 = scmp.lt.s32.totalorder %s84_s20, %s84_s20 }
  0x30   :  { %p2573_p5 = scmp.ne.s32.totalorder %s84_s20, %s2572_s3  ;;  %p2578_p7 = scmp.lt.s32.totalorder %s2572_s3, %s2572_s3 }
  0x32   :  { %p2579_p8 = por %p2578_p7, %p2577_p6 }
  0x34   :  { %p2580_p9 = pnand %p2579_p8, %p2573_p5 }
  0x36   :  { %2583 = shalt.err (!%p2580_p9)
}
  0x37   :  { %s2820_s16 = smov 256   ;;  %s2821_s30 = smov 16  }
  0x38   :  { %89 = dma.hbm_to_vmem [thread:$0]  %s3645_s5, 4096, %s84_s20, [#allocation16], %s2820_s16, %s2820_s16, %s2821_s30  }
  0x39   :  { %s2584_s1 = scalar_lea.hbm %s3647_s7, 32 }
  0x3a   :  { %p2585_p10 = scmp.ne.s32.totalorder %s3647_s7, %s2584_s1  ;;  %p2588_p11 = scmp.lt.u32.totalorder %s2584_s1, %s3647_s7 }
  0x3c   :  { %p2590_p12 = pnand %p2588_p11, %p2585_p10 }
  0x3e   :  { %2593 = shalt.err (!%p2590_p12)
}
  0x3f   :  { %s2594_s21 = scalar_lea.vmem %s107_s22, 32  ;;  %p2599_p0 = scmp.lt.s32.totalorder %s107_s22, %s107_s22 }
  0x40   :  { %p2595_p13 = scmp.ne.s32.totalorder %s107_s22, %s2594_s21  ;;  %p2600_p1 = scmp.lt.s32.totalorder %s2594_s21, %s2594_s21 }
  0x42   :  { %p2601_p2 = por %p2600_p1, %p2599_p0 }
  0x44   :  { %p2602_p3 = pnand %p2601_p2, %p2595_p13 }
  0x46   :  { %2605 = shalt.err (!%p2602_p3)
}
  0x47   :  { %109 = dma.hbm_to_vmem [thread:$0]  %s3647_s7, 32, %s107_s22, [#allocation19]  }
  0x48   :  { %s2822_s23 = smov [#allocation6]   ;;  %s2606_s27 = scalar_lea.hbm %s3640_s0, 512 }
  0x49   :  { %s27_s24 = sshll.u32 %s2822_s23, 4  ;;  %p2607_p4 = scmp.ne.s32.totalorder %s3640_s0, %s2606_s27  ;;  %s28_s24 = int_to_ptr.vmem [resolvable:$true] %s27_s24 }
  0x4a   :  { %p2610_p5 = scmp.lt.u32.totalorder %s2606_s27, %s3640_s0 }
  0x4c   :  { %p2612_p6 = pnand %p2610_p5, %p2607_p4 }
  0x4e   :  { %2615 = shalt.err (!%p2612_p6)
}
  0x4f   :  { %s2616_s12 = scalar_lea.vmem %s28_s24, 512  ;;  %p2621_p8 = scmp.lt.s32.totalorder %s28_s24, %s28_s24 }
  0x50   :  { %p2617_p7 = scmp.ne.s32.totalorder %s28_s24, %s2616_s12  ;;  %p2622_p9 = scmp.lt.s32.totalorder %s2616_s12, %s2616_s12 }
  0x52   :  { %p2623_p10 = por %p2622_p9, %p2621_p8 }
  0x54   :  { %p2624_p11 = pnand %p2623_p10, %p2617_p7 }
  0x56   :  { %2627 = shalt.err (!%p2624_p11)
}
  0x57   :  { %s2823_s7 = smov 64   ;;  %s2824_s22 = smov 4  }
  0x58   :  { %33 = dma.hbm_to_vmem [thread:$0]  %s3640_s0, 512, %s28_s24, [#allocation7], %s2823_s7, %s2823_s7, %s2824_s22  }
  0x59   :  { %s2825_s1 = smov [#allocation11]   ;;  %s2826_s17 = smov [#allocation14]  }
  0x5a   :  { %s50_s14 = sshll.u32 %s2825_s1, 4  ;;  %s71_s18 = sshll.u32 %s2826_s17, 4  ;;  %s51_s14 = int_to_ptr.vmem [resolvable:$true] %s50_s14  ;;  %s72_s18 = int_to_ptr.vmem [resolvable:$true] %s71_s18 }
  0x5b   :  { %s2628_s5 = scalar_lea.hbm %s3642_s2, 16 }
  0x5c   :  { %p2629_p12 = scmp.ne.s32.totalorder %s3642_s2, %s2628_s5  ;;  %p2632_p13 = scmp.lt.u32.totalorder %s2628_s5, %s3642_s2 }
  0x5e   :  { %p2634_p0 = pnand %p2632_p13, %p2629_p12 }
  0x60   :  { %2637 = shalt.err (!%p2634_p0)
}
  0x61   :  { %s2638_s0 = scalar_lea.vmem %s51_s14, 16  ;;  %s2642_s24 = scalar_lea.vmem %s51_s14, 32 }
  0x62   :  { %p2639_p1 = scmp.ne.s32.totalorder %s51_s14, %s2638_s0  ;;  %p2643_p2 = scmp.lt.s32.totalorder %s51_s14, %s51_s14 }
  0x63   :  { %p2644_p3 = scmp.lt.s32.totalorder %s2642_s24, %s2638_s0 }
  0x65   :  { %p2645_p4 = por %p2644_p3, %p2643_p2 }
  0x67   :  { %p2646_p5 = pnand %p2645_p4, %p2639_p1 }
  0x69   :  { %2649 = shalt.err (!%p2646_p5)
}
  0x6a   :  { %53 = dma.hbm_to_vmem [thread:$0]  %s3642_s2, 16, %s51_s14, [#allocation10]  }
  0x6b   :  { %s2650_s11 = scalar_lea.hbm %s3644_s4, 4096 }
  0x6c   :  { %p2651_p6 = scmp.ne.s32.totalorder %s3644_s4, %s2650_s11  ;;  %p2654_p7 = scmp.lt.u32.totalorder %s2650_s11, %s3644_s4 }
  0x6e   :  { %p2656_p8 = pnand %p2654_p7, %p2651_p6 }
  0x70   :  { %2659 = shalt.err (!%p2656_p8)
}
  0x71   :  { %s2660_s17 = scalar_lea.vmem %s72_s18, 4096  ;;  %p2665_p10 = scmp.lt.s32.totalorder %s72_s18, %s72_s18 }
  0x72   :  { %p2661_p9 = scmp.ne.s32.totalorder %s72_s18, %s2660_s17  ;;  %p2666_p11 = scmp.lt.s32.totalorder %s2660_s17, %s2660_s17 }
  0x74   :  { %p2667_p12 = por %p2666_p11, %p2665_p10 }
  0x76   :  { %p2668_p13 = pnand %p2667_p12, %p2661_p9 }
  0x78   :  { %2671 = shalt.err (!%p2668_p13)
}
  0x79   :  { %77 = dma.hbm_to_vmem [thread:$0]  %s3644_s4, 4096, %s72_s18, [#allocation13], %s2820_s16, %s2820_s16, %s2821_s30  }
  0x7a   :  { %s2827_s19 = smov [#allocation17]   ;;  %s2828_s5 = smov [#allocation20]  }
  0x7b   :  { %s96_s21 = sshll.u32 %s2827_s19, 4  ;;  %s115_s20 = sshll.u32 %s2828_s5, 4  ;;  %s97_s21 = int_to_ptr.vmem [resolvable:$true] %s96_s21  ;;  %s116_s20 = int_to_ptr.vmem [resolvable:$true] %s115_s20 }
  0x7c   :  { %s2672_s26 = scalar_lea.hbm %s3646_s6, 128 }
  0x7d   :  { %p2673_p0 = scmp.ne.s32.totalorder %s3646_s6, %s2672_s26  ;;  %p2676_p1 = scmp.lt.u32.totalorder %s2672_s26, %s3646_s6 }
  0x7f   :  { %p2678_p2 = pnand %p2676_p1, %p2673_p0 }
  0x81   :  { %2681 = shalt.err (!%p2678_p2)
}
  0x82   :  { %s2682_s4 = scalar_lea.vmem %s97_s21, 128  ;;  %p2687_p4 = scmp.lt.s32.totalorder %s97_s21, %s97_s21 }
  0x83   :  { %p2683_p3 = scmp.ne.s32.totalorder %s97_s21, %s2682_s4  ;;  %p2688_p5 = scmp.lt.s32.totalorder %s2682_s4, %s2682_s4 }
  0x85   :  { %p2689_p6 = por %p2688_p5, %p2687_p4 }
  0x87   :  { %p2690_p7 = pnand %p2689_p6, %p2683_p3 }
  0x89   :  { %2693 = shalt.err (!%p2690_p7)
}
  0x8a   :  { %99 = dma.hbm_to_vmem [thread:$0]  %s3646_s6, 128, %s97_s21, [#allocation16]  }
  0x8b   :  { %s2694_s3 = scalar_lea.hbm %s3648_s8, 2048 }
  0x8c   :  { %p2695_p8 = scmp.ne.s32.totalorder %s3648_s8, %s2694_s3  ;;  %p2698_p9 = scmp.lt.u32.totalorder %s2694_s3, %s3648_s8 }
  0x8e   :  { %p2700_p10 = pnand %p2698_p9, %p2695_p8 }
  0x90   :  { %2703 = shalt.err (!%p2700_p10)
}
  0x91   :  { %s2704_s1 = scalar_lea.vmem %s116_s20, 2048  ;;  %p2709_p12 = scmp.lt.s32.totalorder %s116_s20, %s116_s20 }
  0x92   :  { %p2705_p11 = scmp.ne.s32.totalorder %s116_s20, %s2704_s1  ;;  %p2710_p13 = scmp.lt.s32.totalorder %s2704_s1, %s2704_s1 }
  0x94   :  { %p2711_p0 = por %p2710_p13, %p2709_p12 }
  0x96   :  { %p2712_p1 = pnand %p2711_p0, %p2705_p11 }
  0x98   :  { %2715 = shalt.err (!%p2712_p1)
}
  0x99   :  { %121 = dma.hbm_to_vmem [thread:$0]  %s3648_s8, 2048, %s116_s20, [#allocation19], %s2823_s7, %s2823_s7, %s2824_s22  }
  0x9a   :  { %s2829_s2 = smov [#allocation21]   ;;  %s2716_s5 = scalar_lea.hbm %s3649_s9, 16 }
  0x9b   :  { %s128_s14 = sshll.u32 %s2829_s2, 4  ;;  %p2717_p2 = scmp.ne.s32.totalorder %s3649_s9, %s2716_s5  ;;  %s129_s14 = int_to_ptr.vmem [resolvable:$true] %s128_s14 }
  0x9c   :  { %p2720_p3 = scmp.lt.u32.totalorder %s2716_s5, %s3649_s9 }
  0x9e   :  { %p2722_p4 = pnand %p2720_p3, %p2717_p2 }
  0xa0   :  { %2725 = shalt.err (!%p2722_p4)
}
  0xa1   :  { %s2726_s24 = scalar_lea.vmem %s129_s14, 16  ;;  %s2730_s8 = scalar_lea.vmem %s129_s14, 32 }
  0xa2   :  { %p2727_p5 = scmp.ne.s32.totalorder %s129_s14, %s2726_s24  ;;  %p2731_p6 = scmp.lt.s32.totalorder %s129_s14, %s129_s14 }
  0xa3   :  { %p2732_p7 = scmp.lt.s32.totalorder %s2730_s8, %s2726_s24 }
  0xa5   :  { %p2733_p8 = por %p2732_p7, %p2731_p6 }
  0xa7   :  { %p2734_p9 = pnand %p2733_p8, %p2727_p5 }
  0xa9   :  { %2737 = shalt.err (!%p2734_p9)
}
  0xaa   :  { %131 = dma.hbm_to_vmem [thread:$0]  %s3649_s9, 16, %s129_s14, [#allocation22]  }
  0xab   :  { %2780 = dma.done.wait [#allocation7], 512  }
  0xac   :  { %2781 = vsyncadd [#allocation7], 4294966784 }
  0xad   :  { %2782 = dma.done.wait [#allocation10], 144  }
  0xae   :  { %2783 = vsyncadd [#allocation10], 4294967152 }
  0xaf   :  { %2784 = dma.done.wait [#allocation13], 6144  }
  0xb0   :  { %2785 = vsyncadd [#allocation13], 4294961152 }
  0xb1   :  { %2786 = dma.done.wait [#allocation16], 4224  }
  0xb2   :  { %2787 = vsyncadd [#allocation16], 4294963072 }
  0xb3   :  { %2788 = dma.done.wait [#allocation19], 2080  }
  0xb4   :  { %2789 = vsyncadd [#allocation19], 4294965216 }
  0xb5   :  { %2790 = dma.done.wait [#allocation22], 16  }
  0xb6   :  { %2791 = vsyncadd [#allocation22], 4294967280  ;;  %v3651_v0 = vmov 0   ;;  %v3031_v1 = vld [vmem:[#allocation14] sm:$0xff]  ;;  %v3033_v2 = vld [vmem:[#allocation14 + $0x8] sm:$0xff]  ;;  %vm329_vm0 = vcmask 261120  }
  0xb7   :  { %374 = vmatprep.mubr.bf16.mxu0 %v3651_v0  ;;  %447 = vmatprep.mubr.bf16.mxu1 %v3651_v0  ;;  %3716 = vst [vmem:[#allocation31_spill] sm:$0xff] %v3031_v1  ;;  %3717 = vst [vmem:[#allocation32_spill] sm:$0xff] %v3033_v2  ;;  %v3035_v3 = vld [vmem:[#allocation14 + $0x10] sm:$0xff]  ;;  %v3037_v4 = vld [vmem:[#allocation14 + $0x18] sm:$0xff]  ;;  %s3318_s9 = smov 0  }
  0xb8   :  { %3718 = vst [vmem:[#allocation33_spill] sm:$0xff] %v3035_v3  ;;  %3719 = vst [vmem:[#allocation34_spill] sm:$0xff] %v3037_v4  ;;  %v3039_v5 = vld [vmem:[#allocation14 + $0x20] sm:$0xff]  ;;  %v3041_v6 = vld [vmem:[#allocation14 + $0x28] sm:$0xff] }
  0xb9   :  { %3720 = vst [vmem:[#allocation35_spill] sm:$0xff] %v3039_v5  ;;  %3721 = vst [vmem:[#allocation36_spill] sm:$0xff] %v3041_v6  ;;  %v3043_v7 = vld [vmem:[#allocation14 + $0x30] sm:$0xff]  ;;  %v3045_v8 = vld [vmem:[#allocation14 + $0x38] sm:$0xff] }
  0xba   :  { %3722 = vst [vmem:[#allocation37_spill] sm:$0xff] %v3043_v7  ;;  %3723 = vst [vmem:[#allocation38_spill] sm:$0xff] %v3045_v8  ;;  %v3047_v9 = vld [vmem:[#allocation14 + $0x40] sm:$0xff]  ;;  %v3049_v10 = vld [vmem:[#allocation14 + $0x48] sm:$0xff] }
  0xbb   :  { %3724 = vst [vmem:[#allocation39_spill] sm:$0xff] %v3047_v9  ;;  %3725 = vst [vmem:[#allocation40_spill] sm:$0xff] %v3049_v10  ;;  %v3051_v11 = vld [vmem:[#allocation14 + $0x50] sm:$0xff]  ;;  %v3053_v12 = vld [vmem:[#allocation14 + $0x58] sm:$0xff] }
  0xbc   :  { %3726 = vst [vmem:[#allocation41_spill] sm:$0xff] %v3051_v11  ;;  %3727 = vst [vmem:[#allocation42_spill] sm:$0xff] %v3053_v12  ;;  %v3055_v13 = vld [vmem:[#allocation14 + $0x60] sm:$0xff]  ;;  %v3057_v14 = vld [vmem:[#allocation14 + $0x68] sm:$0xff] }
  0xbd   :  { %3728 = vst [vmem:[#allocation43_spill] sm:$0xff] %v3055_v13  ;;  %3729 = vst [vmem:[#allocation44_spill] sm:$0xff] %v3057_v14  ;;  %v3059_v15 = vld [vmem:[#allocation14 + $0x70] sm:$0xff]  ;;  %v3061_v16 = vld [vmem:[#allocation14 + $0x78] sm:$0xff] }
  0xbe   :  { %3730 = vst [vmem:[#allocation45_spill] sm:$0xff] %v3059_v15  ;;  %3731 = vst [vmem:[#allocation46_spill] sm:$0xff] %v3061_v16  ;;  %v3063_v17 = vld [vmem:[#allocation14 + $0x80] sm:$0xff]  ;;  %v3065_v18 = vld [vmem:[#allocation14 + $0x88] sm:$0xff] }
  0xbf   :  { %3732 = vst [vmem:[#allocation47_spill] sm:$0xff] %v3063_v17  ;;  %v3067_v19 = vld [vmem:[#allocation14 + $0x90] sm:$0xff]  ;;  %v3069_v20 = vld [vmem:[#allocation14 + $0x98] sm:$0xff]  ;;  %v3071_v21 = vld [vmem:[#allocation14 + $0xa0] sm:$0xff] }
  0xc0   :  { %v3073_v22 = vld [vmem:[#allocation14 + $0xa8] sm:$0xff]  ;;  %v3075_v23 = vld [vmem:[#allocation14 + $0xb0] sm:$0xff]  ;;  %v3077_v24 = vld [vmem:[#allocation14 + $0xb8] sm:$0xff] }
  0xc1   :  { %v3079_v25 = vld [vmem:[#allocation14 + $0xc0] sm:$0xff]  ;;  %v3081_v26 = vld [vmem:[#allocation14 + $0xc8] sm:$0xff]  ;;  %v3083_v27 = vld [vmem:[#allocation14 + $0xd0] sm:$0xff] }
  0xc2   :  { %v3085_v28 = vld [vmem:[#allocation14 + $0xd8] sm:$0xff]  ;;  %v3087_v29 = vld [vmem:[#allocation14 + $0xe0] sm:$0xff]  ;;  %v3089_v30 = vld [vmem:[#allocation14 + $0xe8] sm:$0xff] }
  0xc3   :  { %v3091_v31 = vld [vmem:[#allocation14 + $0xf0] sm:$0xff]  ;;  %v3093_v32 = vld [vmem:[#allocation14 + $0xf8] sm:$0xff]  ;;  %v3095_v33 = vld [vmem:[#allocation15] sm:$0xff] }
  0xc4   :  { %v3097_v34 = vld [vmem:[#allocation15 + $0x8] sm:$0xff]  ;;  %v3099_v35 = vld [vmem:[#allocation15 + $0x10] sm:$0xff]  ;;  %v3101_v36 = vld [vmem:[#allocation15 + $0x18] sm:$0xff] }
  0xc5   :  { %v3103_v37 = vld [vmem:[#allocation15 + $0x20] sm:$0xff]  ;;  %v3105_v38 = vld [vmem:[#allocation15 + $0x28] sm:$0xff]  ;;  %v3107_v39 = vld [vmem:[#allocation15 + $0x30] sm:$0xff] }
  0xc6   :  { %3733 = vst [vmem:[#allocation48_spill] sm:$0xff] %v3103_v37  ;;  %3734 = vst [vmem:[#allocation49_spill] sm:$0xff] %v3105_v38  ;;  %v3109_v40 = vld [vmem:[#allocation15 + $0x38] sm:$0xff]  ;;  %v3111_v41 = vld [vmem:[#allocation15 + $0x40] sm:$0xff] }
  0xc7   :  { %3735 = vst [vmem:[#allocation50_spill] sm:$0xff] %v3109_v40  ;;  %3736 = vst [vmem:[#allocation51_spill] sm:$0xff] %v3111_v41  ;;  %v3113_v42 = vld [vmem:[#allocation15 + $0x48] sm:$0xff]  ;;  %v3115_v43 = vld [vmem:[#allocation15 + $0x50] sm:$0xff] }
  0xc8   :  { %3737 = vst [vmem:[#allocation52_spill] sm:$0xff] %v3113_v42  ;;  %3738 = vst [vmem:[#allocation53_spill] sm:$0xff] %v3115_v43  ;;  %v3117_v44 = vld [vmem:[#allocation15 + $0x58] sm:$0xff]  ;;  %v3119_v45 = vld [vmem:[#allocation15 + $0x60] sm:$0xff] }
  0xc9   :  { %3739 = vst [vmem:[#allocation54_spill] sm:$0xff] %v3117_v44  ;;  %3740 = vst [vmem:[#allocation55_spill] sm:$0xff] %v3119_v45  ;;  %v3121_v46 = vld [vmem:[#allocation15 + $0x68] sm:$0xff]  ;;  %v3123_v47 = vld [vmem:[#allocation15 + $0x70] sm:$0xff] }
  0xca   :  { %3741 = vst [vmem:[#allocation56_spill] sm:$0xff] %v3121_v46  ;;  %3742 = vst [vmem:[#allocation57_spill] sm:$0xff] %v3123_v47  ;;  %v3125_v48 = vld [vmem:[#allocation15 + $0x78] sm:$0xff]  ;;  %v3127_v49 = vld [vmem:[#allocation15 + $0x80] sm:$0xff] }
  0xcb   :  { %3743 = vst [vmem:[#allocation58_spill] sm:$0xff] %v3125_v48  ;;  %3744 = vst [vmem:[#allocation59_spill] sm:$0xff] %v3127_v49  ;;  %v3129_v50 = vld [vmem:[#allocation15 + $0x88] sm:$0xff]  ;;  %v3131_v51 = vld [vmem:[#allocation15 + $0x90] sm:$0xff] }
  0xcc   :  { %3745 = vst [vmem:[#allocation60_spill] sm:$0xff] %v3129_v50  ;;  %3746 = vst [vmem:[#allocation61_spill] sm:$0xff] %v3131_v51  ;;  %v3133_v52 = vld [vmem:[#allocation15 + $0x98] sm:$0xff]  ;;  %v3135_v53 = vld [vmem:[#allocation15 + $0xa0] sm:$0xff] }
  0xcd   :  { %3747 = vst [vmem:[#allocation62_spill] sm:$0xff] %v3133_v52  ;;  %3748 = vst [vmem:[#allocation63_spill] sm:$0xff] %v3135_v53  ;;  %v3137_v54 = vld [vmem:[#allocation15 + $0xa8] sm:$0xff]  ;;  %v3139_v55 = vld [vmem:[#allocation15 + $0xb0] sm:$0xff] }
  0xce   :  { %3749 = vst [vmem:[#allocation64_spill] sm:$0xff] %v3137_v54  ;;  %3750 = vst [vmem:[#allocation65_spill] sm:$0xff] %v3139_v55  ;;  %v3141_v56 = vld [vmem:[#allocation15 + $0xb8] sm:$0xff]  ;;  %v3143_v57 = vld [vmem:[#allocation15 + $0xc0] sm:$0xff] }
  0xcf   :  { %3751 = vst [vmem:[#allocation66_spill] sm:$0xff] %v3141_v56  ;;  %3752 = vst [vmem:[#allocation67_spill] sm:$0xff] %v3143_v57  ;;  %v3145_v58 = vld [vmem:[#allocation15 + $0xc8] sm:$0xff]  ;;  %v3147_v59 = vld [vmem:[#allocation15 + $0xd0] sm:$0xff] }
  0xd0   :  { %3753 = vst [vmem:[#allocation68_spill] sm:$0xff] %v3145_v58  ;;  %3754 = vst [vmem:[#allocation69_spill] sm:$0xff] %v3147_v59  ;;  %v3149_v60 = vld [vmem:[#allocation15 + $0xd8] sm:$0xff]  ;;  %v3151_v61 = vld [vmem:[#allocation15 + $0xe0] sm:$0xff] }
  0xd1   :  { %3755 = vst [vmem:[#allocation70_spill] sm:$0xff] %v3149_v60  ;;  %3756 = vst [vmem:[#allocation71_spill] sm:$0xff] %v3151_v61  ;;  %v3153_v62 = vld [vmem:[#allocation15 + $0xe8] sm:$0xff]  ;;  %v3155_v63 = vld [vmem:[#allocation15 + $0xf0] sm:$0xff] }
  0xd2   :  { %3757 = vst [vmem:[#allocation72_spill] sm:$0xff] %v3153_v62  ;;  %3758 = vst [vmem:[#allocation73_spill] sm:$0xff] %v3155_v63  ;;  %v3157_v0 = vld [vmem:[#allocation15 + $0xf8] sm:$0xff]  ;;  %v171_v53 = vld [vmem:[#allocation12] sm:$0xff] }
  0xd3   :  { %3759 = vst [vmem:[#allocation74_spill] sm:$0xff] %v3157_v0  ;;  %v3159_v54 = vld [vmem:[#allocation9] sm:$0xff]  ;;  %v175_v56 = vld [vmem:[#allocation12 + $0x20] sm:$0xff]  ;;  %v172_v55 = vld [vmem:[#allocation12 + $0x8] sm:$0xff] }
  0xd4   :  { %v176_v57 = vld [vmem:[#allocation12 + $0x28] sm:$0xff]  ;;  %v2113_v50 = vcombine.high %v171_v53, %v175_v56  ;;  %v2112_v52 = vcombine.low %v171_v53, %v175_v56  ;;  %v179_v49 = vld [vmem:[#allocation12 + $0x40] sm:$0xff]  ;;  %v173_v63 = vld [vmem:[#allocation12 + $0x10] sm:$0xff] }
  0xd5   :  { %v2115_v58 = vcombine.high %v172_v55, %v176_v57  ;;  %v2114_v59 = vcombine.low %v172_v55, %v176_v57  ;;  %v183_v60 = vld [vmem:[#allocation12 + $0x60] sm:$0xff]  ;;  %v180_v51 = vld [vmem:[#allocation12 + $0x48] sm:$0xff]  ;;  %v177_v0 = vld [vmem:[#allocation12 + $0x30] sm:$0xff] }
  0xd6   :  { %v2121_v61 = vcombine.high %v179_v49, %v183_v60  ;;  %v184_v46 = vld [vmem:[#allocation12 + $0x68] sm:$0xff]  ;;  %342 = vmatprep.subr.bf16.mxu0 %v2113_v50  ;;  %v2120_v48 = vcombine.low %v179_v49, %v183_v60  ;;  %v174_v47 = vld [vmem:[#allocation12 + $0x18] sm:$0xff]  ;;  %v2117_v53 = vcombine.high %v173_v63, %v177_v0  ;;  %v181_v57 = vld [vmem:[#allocation12 + $0x50] sm:$0xff]  ;;  %v2116_v50 = vcombine.low %v173_v63, %v177_v0 }
  0xd7   :  { %415 = vmatprep.subr.bf16.mxu1 %v2115_v58  ;;  %v2123_v62 = vcombine.high %v180_v51, %v184_v46  ;;  %343 = vmatpush1.bf16.msra.mxu0 %v2112_v52  ;;  %v2122_v45 = vcombine.low %v180_v51, %v184_v46  ;;  %v178_v42 = vld [vmem:[#allocation12 + $0x38] sm:$0xff]  ;;  %v185_v44 = vld [vmem:[#allocation12 + $0x70] sm:$0xff] }
  0xd8   :  { %416 = vmatpush1.bf16.msra.mxu1 %v2114_v59  ;;  %344 = vmatprep.subr.bf16.mxu0 %v2121_v61  ;;  %v2119_v55 = vcombine.high %v174_v47, %v178_v42  ;;  %v2461_v56 = vld [vmem:[#allocation6] sm:$0xff]   ;;  %v2118_v58 = vcombine.low %v174_v47, %v178_v42  ;;  %v2125_v49 = vcombine.high %v181_v57, %v185_v44  ;;  %v3760_v59 = vmov 0   ;;  %v2462_v0 = vld [vmem:[#allocation6 + $0x8] sm:$0xff]   ;;  %v2463_v42 = vld [vmem:[#allocation6 + $0x10] sm:$0xff]  }
  0xd9   :  { %417 = vmatprep.subr.bf16.mxu1 %v2123_v62  ;;  %v182_v41 = vld [vmem:[#allocation12 + $0x58] sm:$0xff]  ;;  %v2124_v51 = vcombine.low %v181_v57, %v185_v44 }
  0xda   :  { %v186_v43 = vld [vmem:[#allocation12 + $0x78] sm:$0xff] }
  0xdb   :  { %345 = vmatpush1.bf16.msra.mxu0 %v2120_v48  ;;  %v2127_v46 = vcombine.high %v182_v41, %v186_v43  ;;  %v2126_v52 = vcombine.low %v182_v41, %v186_v43  ;;  %v2464_v41 = vld [vmem:[#allocation6 + $0x18] sm:$0xff]   ;;  %v3679_v43 = vlaneseq  ;;  %v3198_v48 = vld [vmem:[#allocation17] sm:$0xff] }
  0xdc   :  { %418 = vmatpush1.bf16.msra.mxu1 %v2122_v45  ;;  %488 = vmatprep.subr.bf16.mxu0 %v2117_v53 }
  0xdd   :  { %561 = vmatprep.subr.bf16.mxu1 %v2119_v55  ;;  %v3192_v44 = vshrl.u32 %v3679_v43, 7 }
  0xde   :  { %2128 = vmatmul.mubr.msk.bf16.vlgmr.msra.gmra.mrb[0].mxu0 %vm329_vm0, %v2461_v56 }
  0xdf   :  { %2132 = vmatmul.mubr.msk.bf16.vlgmr.msra.gmra.mrb[0].mxu1 %vm329_vm0, %v2461_v56  ;;  %489 = vmatpush1.bf16.msra.mxu0 %v2116_v50  ;;  %v3195_v45 = vsub.s32 0, %v3192_v44  ;;  %v3678_v47 = vsub.s32 2, %v3192_v44  ;;  %v3201_v60 = vsub.s32 1, %v3192_v44  ;;  %v3677_v61 = vsub.s32 3, %v3192_v44 }
  0xe0   :  { %562 = vmatpush1.bf16.msra.mxu1 %v2118_v58  ;;  %384 = vmatprep.mubr.bf16.mxu0 %v3760_v59 }
  0xe1   :  { %457 = vmatprep.mubr.bf16.mxu1 %v3760_v59  ;;  %490 = vmatprep.subr.bf16.mxu0 %v2125_v49  ;;  %3761 = vst [vmem:[#allocation75_spill] sm:$0xff] %v3195_v45  ;;  %3762 = vst [vmem:[#allocation76_spill] sm:$0xff] %v3201_v60  ;;  %v3206_v62 = vrot.slane %v3198_v48, %v3195_v45  ;;  %v3211_v63 = vrot.slane %v3198_v48, %v3678_v47 }
  0xe2   :  { %563 = vmatprep.subr.bf16.mxu1 %v2127_v46  ;;  %v3215_v53 = vrot.slane %v3198_v48, %v3201_v60  ;;  %v3220_v55 = vrot.slane %v3198_v48, %v3677_v61 }
  0xe3   :  { %491 = vmatpush1.bf16.msra.mxu0 %v2124_v51 }
  0xe4   :  { %564 = vmatpush1.bf16.msra.mxu1 %v2126_v52 }
  0xe6   :  { %2129 = vmatmul.mubr.msk.bf16.gmra.mrb[4].mxu0 %vm329_vm0, %v2462_v0 }
  0xe7   :  { %2133 = vmatmul.mubr.msk.bf16.gmra.mrb[4].mxu1 %vm329_vm0, %v2462_v0  ;;  %394 = vmatprep.mubr.bf16.mxu0 %v3760_v59 }
  0xe8   :  { %467 = vmatprep.mubr.bf16.mxu1 %v3760_v59 }
  0xee   :  { %2130 = vmatmul.mubr.msk.bf16.gmra.mrb[8].mxu0 %vm329_vm0, %v2463_v42 }
  0xef   :  { %2134 = vmatmul.mubr.msk.bf16.gmra.mrb[8].mxu1 %vm329_vm0, %v2463_v42  ;;  %404 = vmatprep.mubr.bf16.mxu0 %v3760_v59 }
  0xf0   :  { %477 = vmatprep.mubr.bf16.mxu1 %v3760_v59 }
  0xf6   :  { %2131 = vmatmul.mubr.msk.bf16.gmra.mrb[12].mxu0 %vm329_vm0, %v2464_v41 }
  0xf7   :  { %2135 = vmatmul.mubr.msk.bf16.gmra.mrb[12].mxu1 %vm329_vm0, %v2464_v41  ;;  %520 = vmatprep.mubr.bf16.mxu0 %v3760_v59 }
  0xf8   :  { %593 = vmatprep.mubr.bf16.mxu1 %v3760_v59 }
  0xfe   :  { %2136 = vmatmul.mubr.msk.bf16.vlgmr.msra.gmra.mrb[16].mxu0 %vm329_vm0, %v2461_v56 }
  0xff   :  { %2140 = vmatmul.mubr.msk.bf16.vlgmr.msra.gmra.mrb[16].mxu1 %vm329_vm0, %v2461_v56  ;;  %530 = vmatprep.mubr.bf16.mxu0 %v3760_v59 }
 0x100   :  { %603 = vmatprep.mubr.bf16.mxu1 %v3760_v59 }
 0x106   :  { %2137 = vmatmul.mubr.msk.bf16.gmra.mrb[20].mxu0 %vm329_vm0, %v2462_v0 }
 0x107   :  { %2141 = vmatmul.mubr.msk.bf16.gmra.mrb[20].mxu1 %vm329_vm0, %v2462_v0  ;;  %540 = vmatprep.mubr.bf16.mxu0 %v3760_v59 }
 0x108   :  { %613 = vmatprep.mubr.bf16.mxu1 %v3760_v59 }
 0x10e   :  { %2138 = vmatmul.mubr.msk.bf16.gmra.mrb[24].mxu0 %vm329_vm0, %v2463_v42 }
 0x10f   :  { %2142 = vmatmul.mubr.msk.bf16.gmra.mrb[24].mxu1 %vm329_vm0, %v2463_v42  ;;  %550 = vmatprep.mubr.bf16.mxu0 %v3760_v59 }
 0x110   :  { %623 = vmatprep.mubr.bf16.mxu1 %v3760_v59 }
 0x116   :  { %2139 = vmatmul.mubr.msk.bf16.gmra.mrb[28].mxu0 %vm329_vm0, %v2464_v41 }
 0x117   :  { %2143 = vmatmul.mubr.msk.bf16.gmra.mrb[28].mxu1 %vm329_vm0, %v2464_v41 }
 0x1b1   :  { %v376_v56 = vpop.f32.mrb[0].mxu0 }
 0x1b2   :  { %v449_v57 = vpop.f32.mrb[0].mxu1  ;;  %v377_v50 = vadd.f32 %v376_v56, %v3206_v62  ;;  %v378_v49 = vpop.f32.mrb[1].mxu0 }
 0x1b3   :  { %v450_v58 = vadd.f32 %v449_v57, %v3211_v63  ;;  %v451_v46 = vpop.f32.mrb[1].mxu1  ;;  %v379_v51 = vadd.f32 %v378_v49, %v3215_v53  ;;  %v380_v59 = vpop.f32.mrb[2].mxu0 }
 0x1b4   :  { %v452_v52 = vadd.f32 %v451_v46, %v3220_v55  ;;  %v453_v0 = vpop.f32.mrb[2].mxu1  ;;  %v381_v42 = vadd.f32 %v380_v59, %v3206_v62  ;;  %v382_v61 = vpop.f32.mrb[3].mxu0 }
 0x1b5   :  { %v454_v41 = vadd.f32 %v453_v0, %v3211_v63  ;;  %v455_v47 = vpop.f32.mrb[3].mxu1  ;;  %v2270_v43 = vpack.c.bf16 %v379_v51, %v377_v50  ;;  %v383_v56 = vadd.f32 %v382_v61, %v3215_v53 }
 0x1b6   :  { %v2271_v45 = vpack.c.bf16 %v452_v52, %v450_v58  ;;  %v456_v57 = vadd.f32 %v455_v47, %v3220_v55 }
 0x1b7   :  { %762 = vst [vmem:[#allocation2] sm:$0xff] %v2270_v43  ;;  %v2272_v60 = vpack.c.bf16 %v383_v56, %v381_v42 }
 0x1b8   :  { %763 = vst [vmem:[#allocation2 + $0x8] sm:$0xff] %v2271_v45  ;;  %v2273_v49 = vpack.c.bf16 %v456_v57, %v454_v41 }
 0x1b9   :  { %764 = vst [vmem:[#allocation2 + $0x10] sm:$0xff] %v2272_v60  ;;  %v386_v46 = vpop.f32.mrb[4].mxu0 }
 0x1ba   :  { %765 = vst [vmem:[#allocation2 + $0x18] sm:$0xff] %v2273_v49  ;;  %v459_v38 = vpop.f32.mrb[4].mxu1  ;;  %v387_v59 = vadd.f32 %v386_v46, %v3206_v62  ;;  %v388_v40 = vpop.f32.mrb[5].mxu0 }
 0x1bb   :  { %v460_v0 = vadd.f32 %v459_v38, %v3211_v63  ;;  %v461_v37 = vpop.f32.mrb[5].mxu1  ;;  %v389_v50 = vadd.f32 %v388_v40, %v3215_v53  ;;  %v390_v58 = vpop.f32.mrb[6].mxu0 }
 0x1bc   :  { %v462_v61 = vadd.f32 %v461_v37, %v3220_v55  ;;  %v463_v47 = vpop.f32.mrb[6].mxu1  ;;  %v391_v43 = vadd.f32 %v390_v58, %v3206_v62  ;;  %v392_v60 = vpop.f32.mrb[7].mxu0 }
 0x1bd   :  { %v464_v45 = vadd.f32 %v463_v47, %v3211_v63  ;;  %v465_v51 = vpop.f32.mrb[7].mxu1  ;;  %v2274_v52 = vpack.c.bf16 %v389_v50, %v387_v59  ;;  %v393_v41 = vadd.f32 %v392_v60, %v3215_v53 }
 0x1be   :  { %v2275_v42 = vpack.c.bf16 %v462_v61, %v460_v0  ;;  %v466_v38 = vadd.f32 %v465_v51, %v3220_v55 }
 0x1bf   :  { %766 = vst [vmem:[#allocation2 + $0x20] sm:$0xff] %v2274_v52  ;;  %v2276_v56 = vpack.c.bf16 %v393_v41, %v391_v43 }
 0x1c0   :  { %767 = vst [vmem:[#allocation2 + $0x28] sm:$0xff] %v2275_v42  ;;  %v2277_v40 = vpack.c.bf16 %v466_v38, %v464_v45 }
 0x1c1   :  { %768 = vst [vmem:[#allocation2 + $0x30] sm:$0xff] %v2276_v56  ;;  %v396_v37 = vpop.f32.mrb[8].mxu0 }
 0x1c2   :  { %769 = vst [vmem:[#allocation2 + $0x38] sm:$0xff] %v2277_v40  ;;  %v469_v57 = vpop.f32.mrb[8].mxu1  ;;  %v397_v49 = vadd.f32 %v396_v37, %v3206_v62  ;;  %v398_v58 = vpop.f32.mrb[9].mxu0 }
 0x1c3   :  { %v470_v46 = vadd.f32 %v469_v57, %v3211_v63  ;;  %v471_v47 = vpop.f32.mrb[9].mxu1  ;;  %v399_v59 = vadd.f32 %v398_v58, %v3215_v53  ;;  %v400_v50 = vpop.f32.mrb[10].mxu0 }
 0x1c4   :  { %v472_v0 = vadd.f32 %v471_v47, %v3220_v55  ;;  %v473_v61 = vpop.f32.mrb[10].mxu1  ;;  %v401_v60 = vadd.f32 %v400_v50, %v3206_v62  ;;  %v402_v45 = vpop.f32.mrb[11].mxu0 }
 0x1c5   :  { %v474_v43 = vadd.f32 %v473_v61, %v3211_v63  ;;  %v475_v51 = vpop.f32.mrb[11].mxu1  ;;  %v2278_v52 = vpack.c.bf16 %v399_v59, %v397_v49  ;;  %v403_v41 = vadd.f32 %v402_v45, %v3215_v53  ;;  %v3690_v49 = vsub.s32 4, %v3192_v44 }
 0x1c6   :  { %v2279_v42 = vpack.c.bf16 %v472_v0, %v470_v46  ;;  %v476_v38 = vadd.f32 %v475_v51, %v3220_v55  ;;  %v3689_v46 = vsub.s32 6, %v3192_v44  ;;  %v3688_v45 = vsub.s32 5, %v3192_v44 }
 0x1c7   :  { %770 = vst [vmem:[#allocation2 + $0x40] sm:$0xff] %v2278_v52  ;;  %v2280_v56 = vpack.c.bf16 %v403_v41, %v401_v60  ;;  %v3687_v51 = vsub.s32 7, %v3192_v44 }
 0x1c8   :  { %771 = vst [vmem:[#allocation2 + $0x48] sm:$0xff] %v2279_v42  ;;  %v2281_v40 = vpack.c.bf16 %v476_v38, %v474_v43 }
 0x1c9   :  { %772 = vst [vmem:[#allocation2 + $0x50] sm:$0xff] %v2280_v56  ;;  %v406_v37 = vpop.f32.mrb[12].mxu0 }
 0x1ca   :  { %773 = vst [vmem:[#allocation2 + $0x58] sm:$0xff] %v2281_v40  ;;  %v479_v57 = vpop.f32.mrb[12].mxu1  ;;  %v407_v58 = vadd.f32 %v406_v37, %v3206_v62  ;;  %v408_v50 = vpop.f32.mrb[13].mxu0 }
 0x1cb   :  { %v480_v47 = vadd.f32 %v479_v57, %v3211_v63  ;;  %v481_v61 = vpop.f32.mrb[13].mxu1  ;;  %v409_v59 = vadd.f32 %v408_v50, %v3215_v53  ;;  %v410_v60 = vpop.f32.mrb[14].mxu0  ;;  %v3261_v50 = vrot.slane %v3198_v48, %v3690_v49 }
 0x1cc   :  { %v482_v0 = vadd.f32 %v481_v61, %v3220_v55  ;;  %v483_v43 = vpop.f32.mrb[14].mxu1  ;;  %v411_v52 = vadd.f32 %v410_v60, %v3206_v62  ;;  %v412_v41 = vpop.f32.mrb[15].mxu0  ;;  %v3266_v61 = vrot.slane %v3198_v48, %v3689_v46 }
 0x1cd   :  { %v484_v42 = vadd.f32 %v483_v43, %v3211_v63  ;;  %v485_v38 = vpop.f32.mrb[15].mxu1  ;;  %v2282_v56 = vpack.c.bf16 %v409_v59, %v407_v58  ;;  %v413_v37 = vadd.f32 %v412_v41, %v3215_v53  ;;  %v3271_v53 = vrot.slane %v3198_v48, %v3688_v45 }
 0x1ce   :  { %v2283_v40 = vpack.c.bf16 %v482_v0, %v480_v47  ;;  %v486_v57 = vadd.f32 %v485_v38, %v3220_v55  ;;  %v3276_v55 = vrot.slane %v3198_v48, %v3687_v51 }
 0x1cf   :  { %774 = vst [vmem:[#allocation2 + $0x60] sm:$0xff] %v2282_v56  ;;  %v2284_v62 = vpack.c.bf16 %v413_v37, %v411_v52 }
 0x1d0   :  { %775 = vst [vmem:[#allocation2 + $0x68] sm:$0xff] %v2283_v40  ;;  %v2285_v63 = vpack.c.bf16 %v486_v57, %v484_v42 }
 0x1d1   :  { %776 = vst [vmem:[#allocation2 + $0x70] sm:$0xff] %v2284_v62  ;;  %v522_v58 = vpop.f32.mrb[16].mxu0 }
 0x1d2   :  { %777 = vst [vmem:[#allocation2 + $0x78] sm:$0xff] %v2285_v63  ;;  %v595_v47 = vpop.f32.mrb[16].mxu1  ;;  %v523_v59 = vadd.f32 %v522_v58, %v3261_v50  ;;  %v524_v60 = vpop.f32.mrb[17].mxu0 }
 0x1d3   :  { %v596_v0 = vadd.f32 %v595_v47, %v3266_v61  ;;  %v597_v43 = vpop.f32.mrb[17].mxu1  ;;  %v525_v52 = vadd.f32 %v524_v60, %v3271_v53  ;;  %v526_v41 = vpop.f32.mrb[18].mxu0 }
 0x1d4   :  { %v598_v42 = vadd.f32 %v597_v43, %v3276_v55  ;;  %v599_v38 = vpop.f32.mrb[18].mxu1  ;;  %v527_v56 = vadd.f32 %v526_v41, %v3261_v50  ;;  %v528_v40 = vpop.f32.mrb[19].mxu0 }
 0x1d5   :  { %v600_v48 = vadd.f32 %v599_v38, %v3266_v61  ;;  %v601_v37 = vpop.f32.mrb[19].mxu1  ;;  %v2286_v57 = vpack.c.bf16 %v525_v52, %v523_v59  ;;  %v529_v63 = vadd.f32 %v528_v40, %v3271_v53 }
 0x1d6   :  { %v2287_v62 = vpack.c.bf16 %v598_v42, %v596_v0  ;;  %v602_v58 = vadd.f32 %v601_v37, %v3276_v55 }
 0x1d7   :  { %906 = vst [vmem:[#allocation3] sm:$0xff] %v2286_v57  ;;  %v2288_v47 = vpack.c.bf16 %v529_v63, %v527_v56 }
 0x1d8   :  { %907 = vst [vmem:[#allocation3 + $0x8] sm:$0xff] %v2287_v62  ;;  %v2289_v60 = vpack.c.bf16 %v602_v58, %v600_v48 }
 0x1d9   :  { %908 = vst [vmem:[#allocation3 + $0x10] sm:$0xff] %v2288_v47  ;;  %v532_v43 = vpop.f32.mrb[20].mxu0 }
 0x1da   :  { %909 = vst [vmem:[#allocation3 + $0x18] sm:$0xff] %v2289_v60  ;;  %v605_v51 = vpop.f32.mrb[20].mxu1  ;;  %v533_v41 = vadd.f32 %v532_v43, %v3261_v50  ;;  %v534_v45 = vpop.f32.mrb[21].mxu0 }
 0x1db   :  { %v606_v38 = vadd.f32 %v605_v51, %v3266_v61  ;;  %v607_v46 = vpop.f32.mrb[21].mxu1  ;;  %v535_v59 = vadd.f32 %v534_v45, %v3271_v53  ;;  %v536_v52 = vpop.f32.mrb[22].mxu0 }
 0x1dc   :  { %v608_v0 = vadd.f32 %v607_v46, %v3276_v55  ;;  %v609_v42 = vpop.f32.mrb[22].mxu1  ;;  %v537_v40 = vadd.f32 %v536_v52, %v3261_v50  ;;  %v538_v48 = vpop.f32.mrb[23].mxu0 }
 0x1dd   :  { %v610_v56 = vadd.f32 %v609_v42, %v3266_v61  ;;  %v611_v37 = vpop.f32.mrb[23].mxu1  ;;  %v2290_v57 = vpack.c.bf16 %v535_v59, %v533_v41  ;;  %v539_v63 = vadd.f32 %v538_v48, %v3271_v53 }
 0x1de   :  { %v2291_v62 = vpack.c.bf16 %v608_v0, %v606_v38  ;;  %v612_v51 = vadd.f32 %v611_v37, %v3276_v55 }
 0x1df   :  { %910 = vst [vmem:[#allocation3 + $0x20] sm:$0xff] %v2290_v57  ;;  %v2292_v58 = vpack.c.bf16 %v539_v63, %v537_v40 }
 0x1e0   :  { %911 = vst [vmem:[#allocation3 + $0x28] sm:$0xff] %v2291_v62  ;;  %v2293_v45 = vpack.c.bf16 %v612_v51, %v610_v56 }
 0x1e1   :  { %912 = vst [vmem:[#allocation3 + $0x30] sm:$0xff] %v2292_v58  ;;  %v542_v46 = vpop.f32.mrb[24].mxu0 }
 0x1e2   :  { %913 = vst [vmem:[#allocation3 + $0x38] sm:$0xff] %v2293_v45  ;;  %v615_v47 = vpop.f32.mrb[24].mxu1  ;;  %v543_v60 = vadd.f32 %v542_v46, %v3261_v50  ;;  %v544_v52 = vpop.f32.mrb[25].mxu0 }
 0x1e3   :  { %v616_v43 = vadd.f32 %v615_v47, %v3266_v61  ;;  %v617_v42 = vpop.f32.mrb[25].mxu1  ;;  %v545_v41 = vadd.f32 %v544_v52, %v3271_v53  ;;  %v546_v59 = vpop.f32.mrb[26].mxu0 }
 0x1e4   :  { %v618_v38 = vadd.f32 %v617_v42, %v3276_v55  ;;  %v619_v0 = vpop.f32.mrb[26].mxu1  ;;  %v547_v48 = vadd.f32 %v546_v59, %v3261_v50  ;;  %v548_v56 = vpop.f32.mrb[27].mxu0 }
 0x1e5   :  { %v620_v40 = vadd.f32 %v619_v0, %v3266_v61  ;;  %v621_v37 = vpop.f32.mrb[27].mxu1  ;;  %v2294_v57 = vpack.c.bf16 %v545_v41, %v543_v60  ;;  %v549_v63 = vadd.f32 %v548_v56, %v3271_v53 }
 0x1e6   :  { %v2295_v62 = vpack.c.bf16 %v618_v38, %v616_v43  ;;  %v622_v51 = vadd.f32 %v621_v37, %v3276_v55 }
 0x1e7   :  { %914 = vst [vmem:[#allocation3 + $0x40] sm:$0xff] %v2294_v57  ;;  %v2296_v58 = vpack.c.bf16 %v549_v63, %v547_v48 }
 0x1e8   :  { %915 = vst [vmem:[#allocation3 + $0x48] sm:$0xff] %v2295_v62  ;;  %v2297_v45 = vpack.c.bf16 %v622_v51, %v620_v40 }
 0x1e9   :  { %916 = vst [vmem:[#allocation3 + $0x50] sm:$0xff] %v2296_v58  ;;  %v552_v46 = vpop.f32.mrb[28].mxu0 }
 0x1ea   :  { %917 = vst [vmem:[#allocation3 + $0x58] sm:$0xff] %v2297_v45  ;;  %v625_v47 = vpop.f32.mrb[28].mxu1  ;;  %v553_v52 = vadd.f32 %v552_v46, %v3261_v50  ;;  %v554_v59 = vpop.f32.mrb[29].mxu0  ;;  %v3310_v46 = vmov 0.0  }
 0x1eb   :  { %v626_v42 = vadd.f32 %v625_v47, %v3266_v61  ;;  %v627_v0 = vpop.f32.mrb[29].mxu1  ;;  %v555_v60 = vadd.f32 %v554_v59, %v3271_v53  ;;  %v556_v41 = vpop.f32.mrb[30].mxu0  ;;  %v3312_v47 = vmov 0.0  }
 0x1ec   :  { %v628_v43 = vadd.f32 %v627_v0, %v3276_v55  ;;  %v629_v38 = vpop.f32.mrb[30].mxu1  ;;  %v557_v56 = vadd.f32 %v556_v41, %v3261_v50  ;;  %v558_v40 = vpop.f32.mrb[31].mxu0  ;;  %v3314_v50 = vmov 0.0  }
 0x1ed   :  { %v630_v48 = vadd.f32 %v629_v38, %v3266_v61  ;;  %v631_v37 = vpop.f32.mrb[31].mxu1  ;;  %v2298_v57 = vpack.c.bf16 %v555_v60, %v553_v52  ;;  %v559_v63 = vadd.f32 %v558_v40, %v3271_v53  ;;  %v3316_v61 = vmov 0.0  }
 0x1ee   :  { %v2299_v62 = vpack.c.bf16 %v628_v43, %v626_v42  ;;  %v632_v51 = vadd.f32 %v631_v37, %v3276_v55 }
 0x1ef   :  { %918 = vst [vmem:[#allocation3 + $0x60] sm:$0xff] %v2298_v57  ;;  %v2300_v58 = vpack.c.bf16 %v559_v63, %v557_v56 }
 0x1f0   :  { %919 = vst [vmem:[#allocation3 + $0x68] sm:$0xff] %v2299_v62  ;;  %v2301_v45 = vpack.c.bf16 %v632_v51, %v630_v48 }
 0x1f1   :  { %920 = vst [vmem:[#allocation3 + $0x70] sm:$0xff] %v2300_v58 }
 0x1f2   :  { %921 = vst [vmem:[#allocation3 + $0x78] sm:$0xff] %v2301_v45 }
 0x1f3 LB: > { %v3763_v17 = vld [vmem:[#allocation47_spill] sm:$0xff]  ;;  %v3764_v16 = vld [vmem:[#allocation46_spill] sm:$0xff]  ;;  %v3765_v15 = vld [vmem:[#allocation45_spill] sm:$0xff]  ;;  %v2831_v56 = vmov 0   ;;  %v2197_v58 = vcombine.high %v3065_v18, %v3069_v20  ;;  %s3375_s20 = ssub.s32 7, %s2812_s9  ;;  %s2302_s27 = sshll.u32 %s2812_s9, 4  ;;  %v2800_v47 = vphi %v3312_v47, %v1565_v47   ;;  %v2796_v46 = vphi %v3310_v46, %v1566_v46   ;;  %s2812_s9 = sphi %s3318_s9, %s992_s9   ;;  %v2808_v61 = vphi %v3316_v61, %v1533_v61   ;;  %v2804_v50 = vphi %v3314_v50, %v1531_v50  }
 0x1f4   : > { %v3766_v14 = vld [vmem:[#allocation44_spill] sm:$0xff]  ;;  %v3767_v13 = vld [vmem:[#allocation43_spill] sm:$0xff]  ;;  %v3768_v12 = vld [vmem:[#allocation42_spill] sm:$0xff]  ;;  %1200 = vmatprep.mubr.bf16.mxu0 %v2831_v56  ;;  %1241 = vmatprep.mubr.bf16.mxu1 %v2831_v56  ;;  %v2195_v63 = vcombine.high %v3763_v17, %v3067_v19  ;;  %v2194_v45 = vcombine.low %v3763_v17, %v3067_v19  ;;  %s1000_s28 = scalar_lea.vmem [#allocation2], %s2302_s27  ;;  %s2303_s4 = sshll.u32 %s3375_s20, 4 }
 0x1f5   : > { %v3769_v11 = vld [vmem:[#allocation41_spill] sm:$0xff]  ;;  %v3770_v10 = vld [vmem:[#allocation40_spill] sm:$0xff]  ;;  %v3771_v9 = vld [vmem:[#allocation39_spill] sm:$0xff]  ;;  %v2191_v40 = vcombine.high %v3767_v13, %v3765_v15  ;;  %v2193_v57 = vcombine.high %v3766_v14, %v3764_v16  ;;  %2465 = vset.pattern.permute.xlu0 %v2831_v56  ;;  %v2190_v62 = vcombine.low %v3767_v13, %v3765_v15  ;;  %v2192_v51 = vcombine.low %v3766_v14, %v3764_v16  ;;  %s1256_s16 = scalar_lea.vmem [#allocation3], %s2303_s4  ;;  %s2250_s30 = sshll.u32 %s2812_s9, 2 }
 0x1f6   : > { %v3772_v8 = vld [vmem:[#allocation38_spill] sm:$0xff]  ;;  %v3773_v7 = vld [vmem:[#allocation37_spill] sm:$0xff]  ;;  %v3774_v6 = vld [vmem:[#allocation36_spill] sm:$0xff]  ;;  %v2187_v43 = vcombine.high %v3771_v9, %v3769_v11  ;;  %v2189_v38 = vcombine.high %v3770_v10, %v3768_v12  ;;  %v2186_v48 = vcombine.low %v3771_v9, %v3769_v11  ;;  %v2188_v37 = vcombine.low %v3770_v10, %v3768_v12  ;;  %s1569_s18 = scalar_lea.vmem [#allocation4], %s2250_s30  ;;  %s2251_s29 = sshll.u32 %s3375_s20, 2 }
 0x1f7   : > { %v3775_v5 = vld [vmem:[#allocation35_spill] sm:$0xff]  ;;  %v3776_v4 = vld [vmem:[#allocation34_spill] sm:$0xff]  ;;  %v3777_v3 = vld [vmem:[#allocation33_spill] sm:$0xff]  ;;  %v2185_v0 = vcombine.high %v3774_v6, %v3772_v8  ;;  %v2184_v41 = vcombine.low %v3774_v6, %v3772_v8  ;;  %s1573_s3 = scalar_lea.vmem [#allocation5], %s2251_s29  ;;  %s992_s9 = sadd.s32 1, %s2812_s9  }
 0x1f8   : > { %v3778_v2 = vld [vmem:[#allocation32_spill] sm:$0xff]  ;;  %v3779_v1 = vld [vmem:[#allocation31_spill] sm:$0xff]  ;;  %v2183_v52 = vcombine.high %v3775_v5, %v3773_v7  ;;  %v2182_v60 = vcombine.low %v3775_v5, %v3773_v7  ;;  %p989_p10 = scmp.ge.s32.totalorder %s992_s9, 8  }
 0x1f9   : > { %v2179_v53 = vcombine.high %v3779_v1, %v3777_v3  ;;  %v2178_v55 = vcombine.low %v3779_v1, %v3777_v3  ;;  %v2181_v42 = vcombine.high %v3778_v2, %v3776_v4  ;;  %v2180_v59 = vcombine.low %v3778_v2, %v3776_v4  ;;  %v3795_v2 = vld [vmem:[#allocation60_spill] sm:$0xff]  ;;  %v3797_v4 = vld [vmem:[#allocation63_spill] sm:$0xff]  ;;  %s2834_s11 = smov (%p989_p10), [#allocation23]  }
 0x1fa   : > { %v3802_v8 = vld [vmem:[#allocation67_spill] sm:$0xff]  ;;  %v3804_v9 = vld [vmem:[#allocation68_spill] sm:$0xff]  ;;  %vm1722_vm3 = vcmask (%p989_p10), 1041409   ;;  %vm1724_vm4 = vcmask (%p989_p10), 1042434   ;;  %vm1726_vm5 = vcmask (%p989_p10), 1043459   ;;  %vm1728_vm6 = vcmask (%p989_p10), 1044484  }
 0x1fb   : > { %1168 = vmatprep.subr.bf16.mxu0 %v2179_v53  ;;  %1209 = vmatprep.subr.bf16.mxu1 %v2181_v42  ;;  %v2199_v53 = vcombine.high %v3071_v21, %v3075_v23  ;;  %v2201_v42 = vcombine.high %v3073_v22, %v3077_v24  ;;  %vm1730_vm7 = vcmask (%p989_p10), 1045509   ;;  %vm1732_vm8 = vcmask (%p989_p10), 1046534   ;;  %s2069_s12 = sshll.u32 (%p989_p10), %s2834_s11, 4  ;;  %s2070_s12 = int_to_ptr.vmem [resolvable:$true] %s2069_s12 }
 0x1fc   : > { %1169 = vmatpush1.bf16.msra.mxu0 %v2178_v55  ;;  %1210 = vmatpush1.bf16.msra.mxu1 %v2180_v59  ;;  %v2196_v55 = vcombine.low %v3065_v18, %v3069_v20  ;;  %v2198_v59 = vcombine.low %v3071_v21, %v3075_v23  ;;  %vm1734_vm9 = vcmask (%p989_p10), 1047559   ;;  %vm1738_vm11 = vcmask (%p989_p10), 64512   ;;  %s2738_s13 = scalar_lea.vmem (%p989_p10), %s2070_s12, 128  ;;  %p2743_p12 = scmp.lt.s32.totalorder (%p989_p10), %s2070_s12, %s2070_s12 }
 0x1fd   : > { %1170 = vmatprep.subr.bf16.mxu0 %v2183_v52  ;;  %1211 = vmatprep.subr.bf16.mxu1 %v2185_v0  ;;  %v1558_v52 = vstv %s3375_s20  ;;  %vm2833_vm12 = vmmov (%p989_p10), 0   ;;  %p2739_p11 = scmp.ne.s32.totalorder (%p989_p10), %s2070_s12, %s2738_s13  ;;  %p2744_p13 = scmp.lt.s32.totalorder (%p989_p10), %s2738_s13, %s2738_s13 }
 0x1fe   : > { %vm1559_vm1 = vcmp.lt.s32.totalorder %v1558_v52, %v3159_v54  ;;  %v2214_v52 = vcombine.low %v3097_v34, %v3101_v36 }
 0x1ff   : > { %v1560_v0 = vsel %vm1559_vm1, 1, %v2831_v56  ;;  %p2745_p0 = por (%p989_p10), %p2744_p13, %p2743_p12 }
 0x200   : > { %1171 = vmatpush1.bf16.msra.mxu0 %v2182_v60  ;;  %1212 = vmatpush1.bf16.msra.mxu1 %v2184_v41  ;;  %v2203_v60 = vcombine.high %v3079_v25, %v3083_v27  ;;  %v2205_v41 = vcombine.high %v3081_v26, %v3085_v28 }
 0x201   : > { %1172 = vmatprep.subr.bf16.mxu0 %v2187_v43  ;;  %1213 = vmatprep.subr.bf16.mxu1 %v2189_v38  ;;  %v2200_v43 = vcombine.low %v3073_v22, %v3077_v24  ;;  %v2202_v38 = vcombine.low %v3079_v25, %v3083_v27  ;;  %p2746_p1 = pnand (%p989_p10), %p2745_p0, %p2739_p11 }
 0x202   : > { %1562 = vperm.xlu0 %2465, %v1560_v0  }
 0x204   : > { %1173 = vmatpush1.bf16.msra.mxu0 %v2186_v48  ;;  %1214 = vmatpush1.bf16.msra.mxu1 %v2188_v37  ;;  %v2207_v48 = vcombine.high %v3087_v29, %v3091_v31  ;;  %v2209_v37 = vcombine.high %v3089_v30, %v3093_v32 }
 0x205   : > { %1174 = vmatprep.subr.bf16.mxu0 %v2191_v40  ;;  %1215 = vmatprep.subr.bf16.mxu1 %v2193_v57  ;;  %v2204_v40 = vcombine.low %v3081_v26, %v3085_v28  ;;  %v2206_v57 = vcombine.low %v3087_v29, %v3091_v31 }
 0x208   : > { %1175 = vmatpush1.bf16.msra.mxu0 %v2190_v62  ;;  %1216 = vmatpush1.bf16.msra.mxu1 %v2192_v51  ;;  %v2213_v62 = vcombine.high %v3095_v33, %v3099_v35  ;;  %v2215_v51 = vcombine.high %v3097_v34, %v3101_v36 }
 0x209   : > { %1176 = vmatprep.subr.bf16.mxu0 %v2195_v63  ;;  %1217 = vmatprep.subr.bf16.mxu1 %v2197_v58  ;;  %v2208_v63 = vcombine.low %v3089_v30, %v3093_v32  ;;  %v1007_v58 = vpack.c.bf16 %v2808_v61, %v2808_v61 }
 0x20c   : > { %1177 = vmatpush1.bf16.msra.mxu0 %v2194_v45  ;;  %1218 = vmatpush1.bf16.msra.mxu1 %v2196_v55  ;;  %v2212_v45 = vcombine.low %v3095_v33, %v3099_v35 }
 0x20d   : > { %1178 = vmatprep.subr.bf16.mxu0 %v2199_v53  ;;  %1219 = vmatprep.subr.bf16.mxu1 %v2201_v42  ;;  %v3780_v53 = vld [vmem:[#allocation48_spill] sm:$0xff]  ;;  %v3781_v42 = vld [vmem:[#allocation50_spill] sm:$0xff] }
 0x20e   : > { %v2217_v55 = vcombine.high %v3780_v53, %v3107_v39  ;;  %v2216_v61 = vcombine.low %v3780_v53, %v3107_v39 }
 0x210   : > { %1179 = vmatpush1.bf16.msra.mxu0 %v2198_v59  ;;  %1220 = vmatpush1.bf16.msra.mxu1 %v2200_v43  ;;  %v3782_v59 = vld [vmem:[#allocation49_spill] sm:$0xff]  ;;  %v3784_v43 = vld [vmem:[#allocation51_spill] sm:$0xff] }
 0x211   : > { %1180 = vmatprep.subr.bf16.mxu0 %v2203_v60  ;;  %1221 = vmatprep.subr.bf16.mxu1 %v2205_v41  ;;  %v2219_v0 = vcombine.high %v3782_v59, %v3781_v42  ;;  %v3783_v60 = vld [vmem:[#allocation53_spill] sm:$0xff] }
 0x212   : > { %v2221_v41 = vcombine.high %v3784_v43, %v3783_v60 }
 0x214   : > { %1181 = vmatpush1.bf16.msra.mxu0 %v2202_v38  ;;  %1222 = vmatpush1.bf16.msra.mxu1 %v2204_v40  ;;  %v2218_v38 = vcombine.low %v3782_v59, %v3781_v42  ;;  %v3786_v40 = vld [vmem:[#allocation52_spill] sm:$0xff] }
 0x215   : > { %1182 = vmatprep.subr.bf16.mxu0 %v2207_v48  ;;  %1223 = vmatprep.subr.bf16.mxu1 %v2209_v37  ;;  %v3785_v48 = vld [vmem:[#allocation54_spill] sm:$0xff] }
 0x216   : > { %v2223_v37 = vcombine.high %v3786_v40, %v3785_v48 }
 0x218   : > { %1183 = vmatpush1.bf16.msra.mxu0 %v2206_v57  ;;  %1224 = vmatpush1.bf16.msra.mxu1 %v2208_v63  ;;  %v2220_v57 = vcombine.low %v3784_v43, %v3783_v60  ;;  %v3788_v63 = vld [vmem:[#allocation55_spill] sm:$0xff] }
 0x219   : > { %1424 = vmatprep.subr.bf16.mxu0 %v2213_v62  ;;  %1465 = vmatprep.subr.bf16.mxu1 %v2215_v51  ;;  %v3787_v62 = vld [vmem:[#allocation57_spill] sm:$0xff] }
 0x21a   : > { %v2225_v51 = vcombine.high %v3788_v63, %v3787_v62 }
 0x21b   : > { %1201 = vmatmul.mubr.bf16.vlgmr.msra.gmra.mrb[0].mxu0 %v1007_v58  ;;  %1242 = vmatmul.mubr.bf16.vlgmr.msra.gmra.mrb[0].mxu1 %v1007_v58  ;;  %v2222_v58 = vcombine.low %v3786_v40, %v3785_v48 }
 0x21c   : > { %1425 = vmatpush1.bf16.msra.mxu0 %v2212_v45  ;;  %1466 = vmatpush1.bf16.msra.mxu1 %v2214_v52  ;;  %v3789_v45 = vld [vmem:[#allocation58_spill] sm:$0xff] }
 0x21d   : > { %1426 = vmatprep.subr.bf16.mxu0 %v2217_v55  ;;  %1467 = vmatprep.subr.bf16.mxu1 %v2219_v0  ;;  %v3790_v55 = vld [vmem:[#allocation56_spill] sm:$0xff]  ;;  %v3791_v0 = vld [vmem:[#allocation61_spill] sm:$0xff] }
 0x21e   : > { %1456 = vmatprep.mubr.bf16.mxu0 %v2831_v56  ;;  %1497 = vmatprep.mubr.bf16.mxu1 %v2831_v56  ;;  %v2227_v52 = vcombine.high %v3790_v55, %v3789_v45  ;;  %v2224_v56 = vcombine.low %v3788_v63, %v3787_v62  ;;  %v2498_v63 = vld [vmem:[#allocation20 + $0x40] sm:$0xff] (%p989_p10)  }
 0x220   : > { %1427 = vmatpush1.bf16.msra.mxu0 %v2216_v61  ;;  %1468 = vmatpush1.bf16.msra.mxu1 %v2218_v38  ;;  %v3792_v61 = vld [vmem:[#allocation59_spill] sm:$0xff]  ;;  %v3794_v38 = vld [vmem:[#allocation62_spill] sm:$0xff] }
 0x221   : > { %1428 = vmatprep.subr.bf16.mxu0 %v2221_v41  ;;  %1469 = vmatprep.subr.bf16.mxu1 %v2223_v37  ;;  %v3793_v49 = vmov %v3792_v61  ;;  %v2229_v1 = vcombine.high %v3792_v61, %v3791_v0  ;;  %v2226_v41 = vcombine.low %v3790_v55, %v3789_v45  ;;  %v2231_v3 = vcombine.high %v3795_v2, %v3794_v38  ;;  %v3799_v61 = vld [vmem:[#allocation64_spill] sm:$0xff]  ;;  %v2499_v45 = vld [vmem:[#allocation20] sm:$0xff] (%p989_p10)  }
 0x222   : > { %v2228_v37 = vcombine.low %v3793_v49, %v3791_v0  ;;  %v3800_v6 = vmov %v3799_v61  ;;  %v2832_v55 = vmov (%p989_p10), 0.0  }
 0x224   : > { %1429 = vmatpush1.bf16.msra.mxu0 %v2220_v57  ;;  %1470 = vmatpush1.bf16.msra.mxu1 %v2222_v58  ;;  %v3796_v57 = vld [vmem:[#allocation65_spill] sm:$0xff]  ;;  %v3798_v58 = vld [vmem:[#allocation66_spill] sm:$0xff] }
 0x225   : > { %1430 = vmatprep.subr.bf16.mxu0 %v2225_v51  ;;  %1471 = vmatprep.subr.bf16.mxu1 %v2227_v52  ;;  %v2233_v5 = vcombine.high %v3797_v4, %v3796_v57  ;;  %v2230_v51 = vcombine.low %v3795_v2, %v3794_v38  ;;  %v2235_v7 = vcombine.high %v3799_v61, %v3798_v58  ;;  %v3806_v61 = vld [vmem:[#allocation71_spill] sm:$0xff] }
 0x226   : > { %v2232_v52 = vcombine.low %v3797_v4, %v3796_v57  ;;  %v3807_v10 = vmov %v3806_v61  ;;  %v2500_v38 = vld [vmem:[#allocation20 + $0x48] sm:$0xff] (%p989_p10)  }
 0x227   :  { %v2501_v57 = vld [vmem:[#allocation20 + $0x8] sm:$0xff] (%p989_p10)  }
 0x228   : > { %1431 = vmatpush1.bf16.msra.mxu0 %v2224_v56  ;;  %1472 = vmatpush1.bf16.msra.mxu1 %v2226_v41  ;;  %v3801_v56 = vld [vmem:[#allocation69_spill] sm:$0xff]  ;;  %v3803_v41 = vld [vmem:[#allocation70_spill] sm:$0xff] }
 0x229   : > { %1432 = vmatprep.subr.bf16.mxu0 %v2229_v1  ;;  %1473 = vmatprep.subr.bf16.mxu1 %v2231_v3  ;;  %v2237_v0 = vcombine.high %v3802_v8, %v3801_v56  ;;  %v2234_v1 = vcombine.low %v3800_v6, %v3798_v58  ;;  %v2239_v2 = vcombine.high %v3804_v9, %v3803_v41  ;;  %v3809_v6 = vld [vmem:[#allocation72_spill] sm:$0xff] }
 0x22a   : > { %v2236_v3 = vcombine.low %v3802_v8, %v3801_v56  ;;  %v2502_v58 = vld [vmem:[#allocation20 + $0x50] sm:$0xff] (%p989_p10)  }
 0x22b   :  { %v2503_v56 = vld [vmem:[#allocation20 + $0x10] sm:$0xff] (%p989_p10)  }
 0x22c   : > { %1433 = vmatpush1.bf16.msra.mxu0 %v2228_v37  ;;  %1474 = vmatpush1.bf16.msra.mxu1 %v2230_v51  ;;  %v3805_v37 = vld [vmem:[#allocation73_spill] sm:$0xff]  ;;  %v3808_v51 = vld [vmem:[#allocation74_spill] sm:$0xff] }
 0x22d   : > { %1434 = vmatprep.subr.bf16.mxu0 %v2233_v5  ;;  %1475 = vmatprep.subr.bf16.mxu1 %v2235_v7  ;;  %v2241_v4 = vcombine.high %v3806_v61, %v3805_v37  ;;  %v2238_v5 = vcombine.low %v3804_v9, %v3803_v41  ;;  %v2243_v7 = vcombine.high %v3809_v6, %v3808_v51 }
 0x230   : > { %1435 = vmatpush1.bf16.msra.mxu0 %v2232_v52  ;;  %1476 = vmatpush1.bf16.msra.mxu1 %v2234_v1  ;;  %v2240_v52 = vcombine.low %v3807_v10, %v3805_v37  ;;  %v1263_v1 = vpack.c.bf16 %v2800_v47, %v2800_v47 }
 0x231   : > { %1436 = vmatprep.subr.bf16.mxu0 %v2237_v0  ;;  %1477 = vmatprep.subr.bf16.mxu1 %v2239_v2  ;;  %v2242_v0 = vcombine.low %v3809_v6, %v3808_v51  ;;  %v1001_v2 = vld [vmem:[%s1000_s28] sm:$0xff] }
 0x232   : > { %v1003_v61 = vunpack.c.l.bf16 %v1001_v2  ;;  %v1004_v8 = vunpack.c.h.bf16 %v1001_v2 }
 0x234   : > { %1437 = vmatpush1.bf16.msra.mxu0 %v2236_v3  ;;  %1478 = vmatpush1.bf16.msra.mxu1 %v2238_v5  ;;  %v1002_v3 = vld [vmem:[%s1000_s28 + $0x8] sm:$0xff] }
 0x235   : > { %1438 = vmatprep.subr.bf16.mxu0 %v2241_v4  ;;  %1479 = vmatprep.subr.bf16.mxu1 %v2243_v7  ;;  %v1005_v9 = vunpack.c.l.bf16 %v1002_v3  ;;  %v1006_v4 = vunpack.c.h.bf16 %v1002_v3 }
 0x238   : > { %1439 = vmatpush1.bf16.msra.mxu0 %v2240_v52  ;;  %1480 = vmatpush1.bf16.msra.mxu1 %v2242_v0 }
 0x239   :  { %2360 = vmatprep.subr.bf16.mxu0 (%p989_p10), %v2832_v55  ;;  %2380 = vmatprep.subr.bf16.mxu1 (%p989_p10), %v2832_v55 }
 0x23b   : > { %1457 = vmatmul.mubr.bf16.vlgmr.msra.gmra.mrb[4].mxu0 %v1263_v1  ;;  %1498 = vmatmul.mubr.bf16.vlgmr.msra.gmra.mrb[4].mxu1 %v1263_v1 }
 0x23c   :  { %2361 = vmatpush3.bf16.msra.mxu0 (%p989_p10), %v2498_v63  ;;  %2381 = vmatpush3.bf16.msra.mxu1 (%p989_p10), %v2499_v45 }
 0x23d   :  { %2362 = vmatprep.subr.bf16.mxu0 (%p989_p10), %v2832_v55  ;;  %2382 = vmatprep.subr.bf16.mxu1 (%p989_p10), %v2832_v55 }
 0x23e   :  { %2376 = vmatprep.mubr.msk.bf16.mxu0 (%p989_p10), %vm2833_vm12, %v2832_v55  ;;  %2396 = vmatprep.mubr.msk.bf16.mxu1 (%p989_p10), %vm2833_vm12, %v2832_v55 }
 0x240   :  { %2363 = vmatpush3.bf16.msra.mxu0 (%p989_p10), %v2500_v38  ;;  %2383 = vmatpush3.bf16.msra.mxu1 (%p989_p10), %v2501_v57 }
 0x241   :  { %2364 = vmatprep.subr.bf16.mxu0 (%p989_p10), %v2832_v55  ;;  %2384 = vmatprep.subr.bf16.mxu1 (%p989_p10), %v2832_v55 }
 0x244   :  { %2365 = vmatpush3.bf16.msra.mxu0 (%p989_p10), %v2502_v58  ;;  %2385 = vmatpush3.bf16.msra.mxu1 (%p989_p10), %v2503_v56  ;;  %v2252_v58 = vld [vmem:[#allocation11] ss:$0 sm:$0xff] (%p989_p10) }
 0x245   :  { %2366 = vmatprep.subr.bf16.mxu0 (%p989_p10), %v2832_v55  ;;  %2386 = vmatprep.subr.bf16.mxu1 (%p989_p10), %v2832_v55  ;;  %vm1679_vm10 = vcmp.lt.s32.totalorder (%p989_p10), %v3192_v44, %v2252_v58 }
 0x2ee   : > { %v1202_v5 = vpop.f32.mrb[0].mxu0  ;;  %v1243_v6 = vpop.f32.mrb[0].mxu1 }
 0x2ef   : > { %v1250_v10 = vadd.f32 %v1202_v5, %v1003_v61  ;;  %v1204_v11 = vpop.f32.mrb[1].mxu0  ;;  %v1252_v13 = vadd.f32 %v1243_v6, %v1005_v9  ;;  %v1245_v47 = vpop.f32.mrb[1].mxu1  ;;  %v1257_v9 = vld [vmem:[%s1256_s16] sm:$0xff] }
 0x2f0   : > { %v1251_v7 = vadd.f32 %v1204_v11, %v1004_v8  ;;  %v1206_v12 = vpop.f32.mrb[2].mxu0  ;;  %v1253_v1 = vadd.f32 %v1245_v47, %v1006_v4  ;;  %v1247_v14 = vpop.f32.mrb[2].mxu1  ;;  %v1260_v4 = vunpack.c.h.bf16 %v1257_v9 }
 0x2f1   : > { %v2244_v52 = vmul.f32 -1.442695, %v1250_v10  ;;  %v1207_v0 = vpop.f32.mrb[3].mxu0  ;;  %v1248_v16 = vpop.f32.mrb[3].mxu1 }
 0x2f2   : > { %v2245_v15 = vmul.f32 -1.442695, %v1251_v7  ;;  %v2246_v2 = vmul.f32 -1.442695, %v1253_v1  ;;  %v1259_v16 = vunpack.c.l.bf16 %v1257_v9 }
 0x2f3   : > { %2466 = vpow2.f32 %v2244_v52 }
 0x2f4   : > { %2468 = vpow2.f32 %v2245_v15 }
 0x2f5   : > { %2470 = vpow2.f32 %v2246_v2 }
 0x2f6   : > { %2472 = vtanh.f32 %v1252_v13  ;;  %v1258_v13 = vld [vmem:[%s1256_s16 + $0x8] sm:$0xff] }
 0x2fd   : > { %v2467_v17 = vpop.eup %2466 }
 0x2fe   : > { %v2469_v3 = vpop.eup %2468  ;;  %v1513_v61 = vadd.f32 1.0, %v2467_v17 }
 0x2ff   : > { %v1519_v5 = vadd.f32 1.0, %v2469_v3  ;;  %v2471_v6 = vpop.eup %2470 }
 0x300   : > { %2474 = vrcp.f32 %v1513_v61  ;;  %v2473_v8 = vpop.eup %2472  ;;  %v1526_v11 = vadd.f32 1.0, %v2471_v6 }
 0x301   : > { %2476 = vrcp.f32 %v1519_v5  ;;  %v1262_v5 = vunpack.c.h.bf16 %v1258_v13 }
 0x302   : > { %2478 = vrcp.f32 %v1526_v11  ;;  %v1261_v11 = vunpack.c.l.bf16 %v1258_v13 }
 0x30a   : > { %v2475_v10 = vpop.eup %2474 }
 0x30b   : > { %v2477_v12 = vpop.eup %2476  ;;  %v1530_v14 = vmul.f32 %v2475_v10, %v2473_v8 }
 0x30c   : > { %v1529_v15 = vmul.f32 %v2804_v50, %v2477_v12  ;;  %v2479_v12 = vpop.eup %2478 }
 0x30e   : > { %v1531_v50 = vadd.f32 %v1530_v14, %v1529_v15   ;;  %v1458_v17 = vpop.f32.mrb[4].mxu0  ;;  %v1499_v52 = vpop.f32.mrb[4].mxu1 }
 0x30f   : > { %v1506_v7 = vadd.f32 %v1458_v17, %v1259_v16  ;;  %v1460_v47 = vpop.f32.mrb[5].mxu0  ;;  %v1501_v2 = vpop.f32.mrb[5].mxu1  ;;  %v1508_v15 = vadd.f32 %v1499_v52, %v1261_v11 }
 0x310   : > { %2480 = vtanh.f32 %v1531_v50  ;;  %v1507_v0 = vadd.f32 %v1460_v47, %v1260_v4  ;;  %v1462_v1 = vpop.f32.mrb[6].mxu0  ;;  %v1503_v6 = vpop.f32.mrb[6].mxu1  ;;  %v1509_v9 = vadd.f32 %v1501_v2, %v1262_v5 }
 0x311   : > { %v2247_v3 = vmul.f32 -1.442695, %v1506_v7  ;;  %v1463_v61 = vpop.f32.mrb[7].mxu0  ;;  %v1504_v10 = vpop.f32.mrb[7].mxu1 }
 0x312   : > { %v2248_v8 = vmul.f32 -1.442695, %v1507_v0  ;;  %v2249_v14 = vmul.f32 -1.442695, %v1509_v9  ;;  %v1563_v5 = vpop.permute.xlu0 %1562 }
 0x313   : > { %2482 = vpow2.f32 %v2247_v3  ;;  %vm1564_vm2 = vcmp.eq.s32.totalorder %v1563_v5, 1 }
 0x314   : > { %2484 = vpow2.f32 %v2248_v8 }
 0x315   : > { %2486 = vpow2.f32 %v2249_v14 }
 0x316   : > { %2488 = vtanh.f32 %v1508_v15  ;;  %v1591_v15 = vld [vmem:[#allocation18] sm:$0x3] (%p989_p10) }
 0x31a   : > { %v2481_v16 = vpop.eup %2480 }
 0x31b   : > { %v1533_v61 = vmul.f32 %v2481_v16, %v2479_v12  }
 0x31d   : > { %v2483_v17 = vpop.eup %2482  ;;  %v1567_v4 = vpack.c.bf16 %v1533_v61, %v1533_v61 }
 0x31e   : > { %v2485_v47 = vpop.eup %2484  ;;  %v1537_v7 = vadd.f32 1.0, %v2483_v17 }
 0x31f   : > { %1570 = vst [vmem:[%s1569_s18] sm:$0xf] %v1567_v4  ;;  %v1543_v0 = vadd.f32 1.0, %v2485_v47  ;;  %v2487_v1 = vpop.eup %2486 }
 0x320   : > { %2490 = vrcp.f32 %v1537_v7  ;;  %v2489_v13 = vpop.eup %2488  ;;  %v1550_v3 = vadd.f32 1.0, %v2487_v1  ;;  %v3810_v7 = vld [vmem:[#allocation76_spill] sm:$0xff] (%p989_p10) }
 0x321   : > { %2492 = vrcp.f32 %v1543_v0  ;;  %v1639_v0 = vrot.slane (%p989_p10), %v1591_v15, %v3810_v7 }
 0x322   : > { %2494 = vrcp.f32 %v1550_v3 }
 0x326   :  { %v3497_v17 = vld [vmem:[#allocation4] sm:$0xff] (%p989_p10)   ;;  %v3521_v25 = vld [vmem:[#allocation4 + $0x10] sm:$0xff] (%p989_p10)   ;;  %v3543_v49 = vld [vmem:[#allocation4 + $0x18] sm:$0xff] (%p989_p10)  }
 0x327   :  { %v2306_v1 = vunpack.c.l.bf16 (%p989_p10), %v3497_v17  ;;  %v2307_v61 = vunpack.c.h.bf16 (%p989_p10), %v3497_v17  ;;  %v2314_v33 = vunpack.c.l.bf16 (%p989_p10), %v3521_v25  ;;  %v2315_v39 = vunpack.c.h.bf16 (%p989_p10), %v3521_v25 }
 0x328   :  { %v2318_v42 = vunpack.c.l.bf16 (%p989_p10), %v3543_v49  ;;  %v2319_v48 = vunpack.c.h.bf16 (%p989_p10), %v3543_v49 }
 0x32a   : > { %v2491_v2 = vpop.eup %2490 }
 0x32b   : > { %v2493_v6 = vpop.eup %2492  ;;  %v1554_v52 = vmul.f32 %v2491_v2, %v2489_v13  ;;  %v3811_v13 = vld [vmem:[#allocation75_spill] sm:$0xff] (%p989_p10) }
 0x32c   : > { %v1553_v8 = vmul.f32 %v2796_v46, %v2493_v6  ;;  %v2495_v9 = vpop.eup %2494  ;;  %v1603_v2 = vrot.slane (%p989_p10), %v1591_v15, %v3811_v13  ;;  %v3507_v6 = vld [vmem:[#allocation4 + $0x8] sm:$0xff] (%p989_p10)  }
 0x32d   :  { %v2310_v23 = vunpack.c.l.bf16 (%p989_p10), %v3507_v6  ;;  %v2311_v29 = vunpack.c.h.bf16 (%p989_p10), %v3507_v6 }
 0x32e   : > { %v1555_v10 = vadd.f32 %v1554_v52, %v1553_v8  ;;  %v1604_v19 = vmul.f32 (%p989_p10), %v2306_v1, %v1603_v2  ;;  %v1605_v21 = vmul.f32 (%p989_p10), %v2307_v61, %v1603_v2  ;;  %v1608_v35 = vmul.f32 (%p989_p10), %v2314_v33, %v1603_v2 }
 0x32f   :  { %v1606_v27 = vmul.f32 (%p989_p10), %v2310_v23, %v1603_v2  ;;  %v1607_v31 = vmul.f32 (%p989_p10), %v2311_v29, %v1603_v2  ;;  %v1609_v50 = vmul.f32 (%p989_p10), %v2315_v39, %v1603_v2  ;;  %v1610_v60 = vmul.f32 (%p989_p10), %v2318_v42, %v1603_v2 }
 0x330   : > { %2496 = vtanh.f32 %v1555_v10  ;;  %v1566_v46 = vsel %vm1564_vm2, %v1555_v10, 0.0   ;;  %1612 = vadd.xlane.f32.xlu0 (%p989_p10), %v1604_v19  ;;  %v1611_v62 = vmul.f32 (%p989_p10), %v2319_v48, %v1603_v2 }
 0x334   :  { %1614 = vadd.xlane.f32.xlu0 (%p989_p10), %v1605_v21 }
 0x338   :  { %1616 = vadd.xlane.f32.xlu0 (%p989_p10), %v1606_v27 }
 0x33a   : > { %v2497_v11 = vpop.eup %2496  ;;  %991 = sbr.rel (!%p989_p10) target bundleno = 499 (0x1f3), region = 111 }
 0x33b   : > { %v1557_v12 = vmul.f32 %v2497_v11, %v2495_v9 }
 0x33c   :  { %1618 = vadd.xlane.f32.xlu0 (%p989_p10), %v1607_v31 }
 0x33d   : > { %v1565_v47 = vsel %vm1564_vm2, %v1557_v12, 0.0  }
 0x33e   : > { %v1571_v14 = vpack.c.bf16 %v1565_v47, %v1565_v47 }
 0x340   : > { %1574 = vst [vmem:[%s1573_s3] sm:$0xf] %v1571_v14  ;;  %1620 = vadd.xlane.f32.xlu0 (%p989_p10), %v1608_v35  ;;  %v3812_v14 = vlaneseq (%p989_p10) }
 0x342   :  { %v1689_v15 = vand.u32 127, %v3812_v14 }
 0x344   :  { %1622 = vadd.xlane.f32.xlu0 %v1609_v50 }
 0x347   :  { %v3495_v16 = vld [vmem:[#allocation5] sm:$0xff]   ;;  %v3505_v5 = vld [vmem:[#allocation5 + $0x8] sm:$0xff]   ;;  %v3519_v24 = vld [vmem:[#allocation5 + $0x10] sm:$0xff]  }
 0x348   :  { %v2322_v4 = vunpack.c.l.bf16 %v3495_v16  ;;  %v2323_v3 = vunpack.c.h.bf16 %v3495_v16  ;;  %v2326_v22 = vunpack.c.l.bf16 %v3505_v5  ;;  %v2327_v28 = vunpack.c.h.bf16 %v3505_v5  ;;  %v3541_v54 = vld [vmem:[#allocation5 + $0x18] sm:$0xff]   ;;  %1624 = vadd.xlane.f32.xlu0 %v1610_v60 }
 0x349   :  { %v2330_v32 = vunpack.c.l.bf16 %v3519_v24  ;;  %v2331_v36 = vunpack.c.h.bf16 %v3519_v24  ;;  %v2334_v53 = vunpack.c.l.bf16 %v3541_v54  ;;  %v2335_v43 = vunpack.c.h.bf16 %v3541_v54 }
 0x34a   :  { %v1640_v18 = vmul.f32 %v2322_v4, %v1639_v0  ;;  %v1641_v20 = vmul.f32 %v2323_v3, %v1639_v0  ;;  %v1642_v26 = vmul.f32 %v2326_v22, %v1639_v0  ;;  %v1643_v30 = vmul.f32 %v2327_v28, %v1639_v0 }
 0x34b   :  { %v1644_v34 = vmul.f32 %v2330_v32, %v1639_v0  ;;  %v1645_v46 = vmul.f32 %v2331_v36, %v1639_v0  ;;  %v1646_v59 = vmul.f32 %v2334_v53, %v1639_v0  ;;  %v1647_v40 = vmul.f32 %v2335_v43, %v1639_v0 }
 0x34c   :  { %1648 = vadd.xlane.f32.xlu1 %v1640_v18  ;;  %1626 = vadd.xlane.f32.xlu0 %v1611_v62 }
 0x350   :  { %1650 = vadd.xlane.f32.xlu1 %v1641_v20  ;;  %v1692_v20 = vsub.s32 %v1689_v15, %v3192_v44 }
 0x354   :  { %1652 = vadd.xlane.f32.xlu1 %v1642_v26 }
 0x358   :  { %1654 = vadd.xlane.f32.xlu1 %v1643_v30 }
 0x35c   :  { %1656 = vadd.xlane.f32.xlu1 %v1644_v34 }
 0x360   :  { %1658 = vadd.xlane.f32.xlu1 %v1645_v46 }
 0x364   :  { %1660 = vadd.xlane.f32.xlu1 %v1646_v59 }
 0x368   :  { %1662 = vadd.xlane.f32.xlu1 %v1647_v40 }
 0x3bd   :  { %v1613_v37 = vpop.xlane.xlu0 %1612 }
 0x3c1   :  { %v1615_v47 = vpop.xlane.xlu0 %1614 }
 0x3c5   :  { %v1617_v8 = vpop.xlane.xlu0 %1616 }
 0x3c9   :  { %v1619_v9 = vpop.xlane.xlu0 %1618 }
 0x3cd   :  { %v1621_v12 = vpop.xlane.xlu0 %1620 }
 0x3d1   :  { %v1623_v19 = vpop.xlane.xlu0 %1622 }
 0x3d5   :  { %v1625_v46 = vpop.xlane.xlu0 %1624 }
 0x3d9   :  { %v1649_v41 = vpop.xlane.xlu1 %1648  ;;  %v1627_v56 = vpop.xlane.xlu0 %1626 }
 0x3da   :  { %v1664_v21 = vadd.f32 %v1649_v41, %v1613_v37 }
 0x3dc   :  { %v1693_v50 = vrot.slane %v1664_v21, %v1692_v20 }
 0x3dd   :  { %v1651_v51 = vpop.xlane.xlu1 %1650 }
 0x3de   :  { %v1665_v0 = vadd.f32 %v1651_v51, %v1615_v47 }
 0x3e0   :  { %v1697_v30 = vrot.slane %v1665_v0, %v1692_v20 }
 0x3e1   :  { %v1653_v52 = vpop.xlane.xlu1 %1652 }
 0x3e2   :  { %v1666_v2 = vadd.f32 %v1653_v52, %v1617_v8  ;;  %v1723_v62 = vsel %vm1722_vm3, %v1697_v30, %v1693_v50  ;;  %v2504_v50 = vld [vmem:[#allocation20 + $0x58] sm:$0xff]  }
 0x3e3   :  { %2367 = vmatpush3.bf16.msra.mxu0 %v2504_v50 }
 0x3e4   :  { %v1701_v34 = vrot.slane %v1666_v2, %v1692_v20  ;;  %2368 = vmatprep.subr.bf16.mxu0 %v2832_v55 }
 0x3e5   :  { %v1655_v10 = vpop.xlane.xlu1 %1654 }
 0x3e6   :  { %v1667_v26 = vadd.f32 %v1655_v10, %v1619_v9  ;;  %v1725_v45 = vsel %vm1724_vm4, %v1701_v34, %v1723_v62 }
 0x3e8   :  { %v1705_v59 = vrot.slane %v1667_v26, %v1692_v20 }
 0x3e9   :  { %v1657_v11 = vpop.xlane.xlu1 %1656 }
 0x3ea   :  { %v1668_v27 = vadd.f32 %v1657_v11, %v1621_v12  ;;  %v1727_v41 = vsel %vm1726_vm5, %v1705_v59, %v1725_v45  ;;  %v2505_v59 = vld [vmem:[#allocation20 + $0x18] sm:$0xff]   ;;  %v2508_v45 = vld [vmem:[#allocation20 + $0x68] sm:$0xff]  }
 0x3eb   :  { %2387 = vmatpush3.bf16.msra.mxu1 %v2505_v59 }
 0x3ec   :  { %v1709_v40 = vrot.slane %v1668_v27, %v1692_v20  ;;  %2388 = vmatprep.subr.bf16.mxu1 %v2832_v55 }
 0x3ed   :  { %v1659_v18 = vpop.xlane.xlu1 %1658 }
 0x3ee   :  { %v1669_v31 = vadd.f32 %v1659_v18, %v1623_v19  ;;  %v1729_v51 = vsel %vm1728_vm6, %v1709_v40, %v1727_v41  ;;  %v2507_v40 = vld [vmem:[#allocation20 + $0x20] sm:$0xff]   ;;  %v2511_v41 = vld [vmem:[#allocation20 + $0x30] sm:$0xff]  }
 0x3ef   :  { %2389 = vmatpush3.bf16.msra.mxu1 %v2507_v40 }
 0x3f0   :  { %v1713_v63 = vrot.slane %v1669_v31, %v1692_v20  ;;  %2390 = vmatprep.subr.bf16.mxu1 %v2832_v55 }
 0x3f1   :  { %v1661_v35 = vpop.xlane.xlu1 %1660 }
 0x3f2   :  { %v1670_v60 = vadd.f32 %v1661_v35, %v1625_v46  ;;  %v1731_v47 = vsel %vm1730_vm7, %v1713_v63, %v1729_v51 }
 0x3f4   :  { %v1717_v38 = vrot.slane %v1670_v60, %v1692_v20  ;;  %v2506_v60 = vld [vmem:[#allocation20 + $0x60] sm:$0xff]  }
 0x3f5   :  { %v1663_v57 = vpop.xlane.xlu1 %1662  ;;  %2369 = vmatpush3.bf16.msra.mxu0 %v2506_v60 }
 0x3f6   :  { %v1671_v37 = vadd.f32 %v1663_v57, %v1627_v56  ;;  %v1733_v8 = vsel %vm1732_vm8, %v1717_v38, %v1731_v47  ;;  %2370 = vmatprep.subr.bf16.mxu0 %v2832_v55  ;;  %v2509_v38 = vld [vmem:[#allocation20 + $0x28] sm:$0xff]   ;;  %v2510_v56 = vld [vmem:[#allocation20 + $0x70] sm:$0xff]   ;;  %v3814_v47 = vsub.s32 4, %v3192_v44 }
 0x3f7   :  { %2391 = vmatpush3.bf16.msra.mxu1 %v2509_v38 }
 0x3f8   :  { %v1721_v52 = vrot.slane %v1671_v37, %v1692_v20  ;;  %v3813_v37 = vsub.s32 2, %v3192_v44  ;;  %2392 = vmatprep.subr.bf16.mxu1 %v2832_v55 }
 0x3f9   :  { %2371 = vmatpush3.bf16.msra.mxu0 %v2508_v45 }
 0x3fa   :  { %v1735_v10 = vsel %vm1734_vm9, %v1721_v52, %v1733_v8  ;;  %2372 = vmatprep.subr.bf16.mxu0 %v2832_v55  ;;  %v3815_v8 = vsub.s32 3, %v3192_v44 }
 0x3fb   :  { %v1737_v9 = vsel %vm1679_vm10, %v1735_v10, -1e+09  ;;  %2393 = vmatpush3.bf16.msra.mxu1 %v2511_v41 }
 0x3fc   :  { %v1739_v11 = vsel %vm1738_vm11, %v1737_v9, -inf  ;;  %2394 = vmatprep.subr.bf16.mxu1 %v2832_v55 }
 0x3fd   :  { %v1740_v12 = vrot.slane %v1739_v11, 4  ;;  %2373 = vmatpush3.bf16.msra.mxu0 %v2510_v56 }
 0x3fe   :  { %2374 = vmatprep.subr.bf16.mxu0 %v2832_v55 }
 0x3ff   :  { %v1741_v14 = vmax.f32 %v1739_v11, %v1740_v12  ;;  %v3817_v12 = vsub.s32 5, %v3192_v44 }
 0x401   :  { %v1742_v15 = vrot.slane %v1741_v14, 2 }
 0x403   :  { %v1743_v0 = vmax.f32 %v1741_v14, %v1742_v15  ;;  %v3818_v15 = vsub.s32 7, %v3192_v44 }
 0x405   :  { %v1744_v2 = vrot.slane %v1743_v0, 1 }
 0x407   :  { %v1745_v18 = vmax.f32 %v1743_v0, %v1744_v2 }
 0x409   :  { %v1746_v19 = vsub.f32 %v1737_v9, %v1745_v18  ;;  %v3816_v9 = vsub.s32 6, %v3192_v44 }
 0x40b   :  { %v1747_v21 = vmul.f32 1.442695, %v1746_v19 }
 0x40d   :  { %2514 = vpow2.f32 %v1747_v21 }
 0x417   :  { %v2515_v26 = vpop.eup %2514 }
 0x418   :  { %v1749_v27 = vsel %vm1738_vm11, %v2515_v26, 0.0 }
 0x419   :  { %v1750_v30 = vrot.slane %v1749_v27, 4 }
 0x41b   :  { %v1751_v31 = vadd.f32 %v1750_v30, %v1749_v27 }
 0x41d   :  { %v1752_v34 = vrot.slane %v1751_v31, 2 }
 0x41f   :  { %v1753_v20 = vadd.f32 %v1752_v34, %v1751_v31 }
 0x421   :  { %v1754_v35 = vrot.slane %v1753_v20, 1 }
 0x423   :  { %v1755_v46 = vadd.f32 %v1754_v35, %v1753_v20 }
 0x425   :  { %2516 = vrcp.f32 %v1755_v46 }
 0x42f   :  { %v2517_v62 = vpop.eup %2516 }
 0x430   :  { %v1757_v63 = vmul.f32 %v2517_v62, %v2515_v26 }
 0x432   :  { %v1768_v57 = vrot.slane %v1757_v63, %v3810_v7  ;;  %v1761_v58 = vrot.slane %v1757_v63, %v3811_v13  ;;  %v1775_v51 = vrot.slane %v1757_v63, %v3813_v37  ;;  %v1789_v52 = vrot.slane %v1757_v63, %v3814_v47  ;;  %v2512_v7 = vld [vmem:[#allocation20 + $0x78] sm:$0xff]  }
 0x433   :  { %v2513_v13 = vld [vmem:[#allocation20 + $0x38] sm:$0xff]   ;;  %v1782_v10 = vrot.slane %v1757_v63, %v3815_v8  ;;  %v1803_v11 = vrot.slane %v1757_v63, %v3816_v9  ;;  %2375 = vmatpush3.bf16.msra.mxu0 %v2512_v7  ;;  %v1796_v14 = vrot.slane %v1757_v63, %v3817_v12  ;;  %v1810_v0 = vrot.slane %v1757_v63, %v3818_v15 }
 0x434   :  { %1770 = vbcast.lane.b32.xlu1 %v1768_v57, 256  ;;  %1763 = vbcast.lane.b32.xlu0 %v1761_v58, 256 }
 0x435   :  { %2395 = vmatpush3.bf16.msra.mxu1 %v2513_v13 }
 0x438   :  { %1777 = vbcast.lane.b32.xlu1 %v1775_v51, 256  ;;  %1791 = vbcast.lane.b32.xlu0 %v1789_v52, 256 }
 0x43c   :  { %1784 = vbcast.lane.b32.xlu1 %v1782_v10, 256  ;;  %1805 = vbcast.lane.b32.xlu0 %v1803_v11, 256 }
 0x440   :  { %1798 = vbcast.lane.b32.xlu1 %v1796_v14, 256 }
 0x444   :  { %1812 = vbcast.lane.b32.xlu1 %v1810_v0, 256 }
 0x4a6   :  { %v1771_v2 = vpop.permute.xlu1 %1770  ;;  %v1764_v18 = vpop.permute.xlu0 %1763 }
 0x4a7   :  { %v1815_v19 = vmul.f32 %v2307_v61, %v1771_v2  ;;  %v1830_v21 = vmul.f32 %v2323_v3, %v1771_v2  ;;  %v1814_v26 = vmul.f32 %v2306_v1, %v1764_v18  ;;  %v1829_v27 = vmul.f32 %v2322_v4, %v1764_v18 }
 0x4a9   :  { %v1822_v34 = vadd.f32 %v1815_v19, %v1814_v26  ;;  %v1837_v20 = vadd.f32 %v1830_v21, %v1829_v27 }
 0x4aa   :  { %v1778_v55 = vpop.permute.xlu1 %1777  ;;  %v1792_v31 = vpop.permute.xlu0 %1791 }
 0x4ab   :  { %v1816_v44 = vmul.f32 %v2310_v23, %v1778_v55  ;;  %v1831_v30 = vmul.f32 %v2326_v22, %v1778_v55  ;;  %v1818_v4 = vmul.f32 %v2314_v33, %v1792_v31  ;;  %v1833_v1 = vmul.f32 %v2330_v32, %v1792_v31 }
 0x4ad   :  { %v1823_v35 = vadd.f32 %v1822_v34, %v1816_v44  ;;  %v1838_v46 = vadd.f32 %v1837_v20, %v1831_v30 }
 0x4ae   :  { %v1785_v61 = vpop.permute.xlu1 %1784  ;;  %v1806_v23 = vpop.permute.xlu0 %1805 }
 0x4af   :  { %v1817_v17 = vmul.f32 %v2311_v29, %v1785_v61  ;;  %v1832_v16 = vmul.f32 %v2327_v28, %v1785_v61  ;;  %v1820_v5 = vmul.f32 %v2318_v42, %v1806_v23  ;;  %v1835_v28 = vmul.f32 %v2334_v53, %v1806_v23  ;;  %v2269_v53 = vld [vmem:[#allocation21] ss:$0 sm:$0xff] }
 0x4b1   :  { %v1824_v3 = vadd.f32 %v1823_v35, %v1817_v17  ;;  %v1839_v22 = vadd.f32 %v1838_v46, %v1832_v16 }
 0x4b2   :  { %v1799_v50 = vpop.permute.xlu1 %1798 }
 0x4b3   :  { %v1819_v59 = vmul.f32 %v2315_v39, %v1799_v50  ;;  %v1825_v60 = vadd.f32 %v1824_v3, %v1818_v4  ;;  %v1834_v6 = vmul.f32 %v2331_v36, %v1799_v50  ;;  %v1840_v29 = vadd.f32 %v1839_v22, %v1833_v1 }
 0x4b5   :  { %v1826_v33 = vadd.f32 %v1825_v60, %v1819_v59  ;;  %v1841_v32 = vadd.f32 %v1840_v29, %v1834_v6 }
 0x4b6   :  { %v1813_v40 = vpop.permute.xlu1 %1812 }
 0x4b7   :  { %v1821_v62 = vmul.f32 %v2319_v48, %v1813_v40  ;;  %v1827_v63 = vadd.f32 %v1826_v33, %v1820_v5  ;;  %v1836_v25 = vmul.f32 %v2335_v43, %v1813_v40  ;;  %v1842_v39 = vadd.f32 %v1841_v32, %v1835_v28 }
 0x4b9   :  { %v1828_v24 = vadd.f32 %v1827_v63, %v1821_v62  ;;  %v1843_v36 = vadd.f32 %v1842_v39, %v1836_v25 }
 0x4bb   :  { %v1876_v45 = vpack.c.bf16 %v1828_v24, %v1828_v24  ;;  %v1877_v38 = vpack.c.bf16 %v1843_v36, %v1843_v36 }
 0x4bd   :  { %2377 = vmatmul.mubr.bf16.vlgmr.msra.gmra.mrb[0].mxu0 %v1877_v38  ;;  %2397 = vmatmul.mubr.bf16.vlgmr.msra.gmra.mrb[0].mxu1 %v1876_v45 }
 0x590   :  { %v1960_v42 = vpop.f32.mrb[0].mxu0  ;;  %v2048_v57 = vpop.f32.mrb[0].mxu1 }
 0x591   :  { %v2049_v58 = vadd.f32 %v2048_v57, %v1960_v42  ;;  %v2378_v56 = vpop.f32.mrb[1].mxu0  ;;  %v2398_v49 = vpop.f32.mrb[1].mxu1 }
 0x592   :  { %v1963_v48 = vpop.f32.mrb[2].mxu0  ;;  %v2051_v41 = vpop.f32.mrb[2].mxu1 }
 0x593   :  { %v2379_v37 = vpop.f32.mrb[3].mxu0  ;;  %v2399_v54 = vpop.f32.mrb[3].mxu1  ;;  %v2061_v43 = vadd.f32 %v2269_v53, %v2049_v58 }
 0x595   :  { %2062 = vst [vmem:[#allocation23] sm:$0xff] %v2061_v43 }
 0x596   :  { %2749 = shalt.err (!%p2746_p1)
}
 0x597   :  { %s2750_s6 = scalar_lea.hbm %s3650_s10, 128 }
 0x598   :  { %p2751_p2 = scmp.ne.s32.totalorder %s3650_s10, %s2750_s6  ;;  %p2754_p3 = scmp.lt.u32.totalorder %s2750_s6, %s3650_s10 }
 0x59a   :  { %p2756_p4 = pnand %p2754_p3, %p2751_p2 }
 0x59c   :  { %2759 = shalt.err (!%p2756_p4)
}
 0x59d   :  { %2072 = dma.vmem_to_hbm [thread:$0]  %s2070_s12, 128, %s3650_s10, [#allocation8]  }
 0x59e   :  { %2792 = dma.done.wait [#allocation8], 128  }
 0x59f   :  { %2793 = vsyncadd [#allocation8], 4294967168 }
 0x5a0   :  { %2076 = vsyncpa [#allocation7], 1 }
 0x5a1   :  { %2077 = vsyncpa [#allocation10], 1 }
 0x5a2   :  { %2078 = vsyncpa [#allocation13], 1 }
 0x5a3   :  { %2079 = vsyncpa [#allocation16], 1 }
 0x5a4   :  { %2080 = vsyncpa [#allocation19], 1 }
 0x5a5   :  { %2081 = vsyncpa [#allocation22], 1 }
 0x5a6   :  { %2082 = vsyncpa [#allocation8], 1 }

</bundles_post_ra>
